<compile_context>
chip_gen: v6e
topology: v6e:2x2x1
jax: 0.10.0
libtpu: 0.0.40
codegen_flags: <defaults>
</compile_context>

<pallas_src>
import functools

import jax
import jax.numpy as jnp
from jax.experimental import pallas as pl
from jax.experimental.pallas import tpu as pltpu

# ---------------- scaled-down DINOv2 ViT-L/14 config ----------------
IMG = 28                      # real: 224
PATCH = 14                    # real: 14  (ViT-L/14)
IN_CH = 3
GRID_SIZE = IMG // PATCH      # 2
NUM_PATCHES = GRID_SIZE ** 2  # 4    (real: 256)
NUM_TOKENS = NUM_PATCHES + 1  # 5    (real: 257, +cls token)
NUM_TOKENS_PAD = ((NUM_TOKENS + 7) // 8) * 8        # 8 (sublane-aligned token count)
PATCH_DIM = IN_CH * PATCH * PATCH                   # 588
PATCH_DIM_PAD = ((PATCH_DIM + 127) // 128) * 128    # 640 (lane-aligned contraction K)
EMBED_DIM = 128               # real: 1024
NUM_HEADS = 2                 # real: 16 (head_dim=64 matches the real model)
HEAD_DIM = EMBED_DIM // NUM_HEADS   # 64
MLP_DIM = 4 * EMBED_DIM       # real: 4096
DEPTH = 2                     # real: 24
NUM_CLASSES = 2
LN_EPS = 1e-6
HEAD_PAD = 128                # lane-dense padded classifier output width


# ---------------- in-kernel helpers ----------------
def _layernorm(x, g, b, eps):
    mean = jnp.mean(x, axis=-1, keepdims=True)
    xc = x - mean
    var = jnp.mean(xc * xc, axis=-1, keepdims=True)
    return xc * jax.lax.rsqrt(var + eps) * g + b


def _erf(x):
    # Abramowitz & Stegun 7.1.26 (max abs error 1.5e-7): exact-GELU semantics
    # (DINOv2 uses nn.GELU, not tanh approx) using only abs/exp/select VALU/EUP ops.
    a1, a2, a3, a4, a5 = 0.254829592, -0.284496736, 1.421413741, -1.453152027, 1.061405429
    p = 0.3275911
    ax = jnp.abs(x)
    t = 1.0 / (1.0 + p * ax)
    poly = ((((a5 * t + a4) * t + a3) * t + a2) * t + a1) * t
    y = 1.0 - poly * jnp.exp(-ax * ax)
    return jnp.where(x >= 0, y, -y)


def _gelu_exact(x):
    return 0.5 * x * (1.0 + _erf(x * 0.7071067811865475))


# ---------------- Pallas kernels ----------------
def _embed_kernel(patch_ref, w_ref, b_ref, cls_ref, pos_ref, out_ref, *, batch, np_, n_pad):
    # One matmul for the whole batch: (B*NP, PDIM_PAD) @ (PDIM_PAD, D).
    emb = jnp.dot(patch_ref[...].astype(jnp.bfloat16), w_ref[...],
                  preferred_element_type=jnp.float32) + b_ref[...]          # (B*NP, D)
    zero_tail = jnp.zeros((n_pad - 1 - np_, EMBED_DIM), jnp.float32)
    for b in range(batch):
        img = jnp.concatenate(
            [cls_ref[...],                                    # cls token (+ its pos embed)
             emb[b * np_:(b + 1) * np_, :] + pos_ref[...],    # patch tokens + pos embed
             zero_tail],                                      # sublane padding rows
            axis=0)                                           # (n_pad, D)
        out_ref[b] = img


def _blocks_kernel(tok_ref,
                   ln1_g, ln1_b, qkv_w, qkv_b, proj_w, proj_b, ls1,
                   ln2_g, ln2_b, fc1_w, fc1_b, fc2_w, fc2_b, ls2,
                   out_ref, *, batch, n_pad, n_tok, num_heads, head_dim, scale, eps):
    """All DEPTH transformer blocks, one image-batch slab, grid axis = depth.

    The residual token slab is carried across the depth grid axis inside the resident
    output block (constant output index_map), so it never leaves VMEM between blocks,
    while next-block weights are double-buffered by the BlockSpec pipeline.
    """
    d_model = num_heads * head_dim

    @pl.when(pl.program_id(0) == 0)
    def _():
        out_ref[...] = tok_ref[...]

    x = out_ref[...].reshape(batch * n_pad, d_model)          # (B*Np, D) f32 residual

    # ---- LN1 fused with QKV projection over the whole batch ----
    h = _layernorm(x, ln1_g[0], ln1_b[0], eps)
    qkv = jnp.dot(h.astype(jnp.bfloat16), qkv_w[0],
                  preferred_element_type=jnp.float32) + qkv_b[0]            # (B*Np, 3D)

    # key-side mask so the sublane-padding tokens never receive attention weight
    key_ids = jax.lax.broadcasted_iota(jnp.int32, (1, n_pad), 1)
    mask_bias = jnp.where(key_ids < n_tok, 0.0, -1e30)

    img_outs = []
    for b in range(batch):
        r0 = b * n_pad                                        # 8-aligned sublane offset
        head_outs = []
        for hh in range(num_heads):
            lo = hh * head_dim
            q = qkv[r0:r0 + n_pad, lo:lo + head_dim] * scale
            k = qkv[r0:r0 + n_pad, d_model + lo:d_model + lo + head_dim]
            v = qkv[r0:r0 + n_pad, 2 * d_model + lo:2 * d_model + lo + head_dim]
            # contract last dims of both operands: no transposed k is materialized
            s = jax.lax.dot_general(q.astype(jnp.bfloat16), k.astype(jnp.bfloat16),
                                    (((1,), (1,)), ((), ())),
                                    preferred_element_type=jnp.float32) + mask_bias
            m = jnp.max(s, axis=-1, keepdims=True)
            p = jnp.exp(s - m)
            p = p * pl.reciprocal(jnp.sum(p, axis=-1, keepdims=True), approx=True)
            head_outs.append(jnp.dot(p.astype(jnp.bfloat16), v.astype(jnp.bfloat16),
                                     preferred_element_type=jnp.float32))   # (Np, Hd)
        img_outs.append(jnp.concatenate(head_outs, axis=-1))                # (Np, D)
    o = jnp.concatenate(img_outs, axis=0)                                   # (B*Np, D)

    # ---- output projection + LayerScale + residual ----
    proj = jnp.dot(o.astype(jnp.bfloat16), proj_w[0],
                   preferred_element_type=jnp.float32) + proj_b[0]
    x = x + ls1[0] * proj

    # ---- LN2 + MLP (fc1 -> exact erf-GELU -> fc2) + LayerScale + residual ----
    h = _layernorm(x, ln2_g[0], ln2_b[0], eps)
    h = jnp.dot(h.astype(jnp.bfloat16), fc1_w[0],
                preferred_element_type=jnp.float32) + fc1_b[0]
    h = _gelu_exact(h)
    mlp = jnp.dot(h.astype(jnp.bfloat16), fc2_w[0],
                  preferred_element_type=jnp.float32) + fc2_b[0]
    x = x + ls2[0] * mlp

    out_ref[...] = x.reshape(batch, n_pad, d_model)


def _norm_head_kernel(x_ref, g_ref, b_ref, w_ref, hb_ref, out_ref, *, eps):
    # Final LayerNorm on the cls tokens fused with the classifier head
    # (head width pre-padded to 128 lanes so the store is unmasked / lane-dense).
    x = _layernorm(x_ref[...], g_ref[...], b_ref[...], eps)
    out_ref[...] = jnp.dot(x.astype(jnp.bfloat16), w_ref[...],
                           preferred_element_type=jnp.float32) + hb_ref[...]


# ---------------- pallas_call wrappers ----------------
def pallas_embed(patches, prep, batch):
    return pl.pallas_call(
        functools.partial(_embed_kernel, batch=batch, np_=NUM_PATCHES, n_pad=NUM_TOKENS_PAD),
        out_shape=jax.ShapeDtypeStruct((batch, NUM_TOKENS_PAD, EMBED_DIM), jnp.float32),
        grid=(1,),
        in_specs=[
            pl.BlockSpec((batch * NUM_PATCHES, PATCH_DIM_PAD), lambda i: (0, 0)),
            pl.BlockSpec((PATCH_DIM_PAD, EMBED_DIM), lambda i: (0, 0)),
            pl.BlockSpec((1, EMBED_DIM), lambda i: (0, 0)),
            pl.BlockSpec((1, EMBED_DIM), lambda i: (0, 0)),
            pl.BlockSpec((NUM_PATCHES, EMBED_DIM), lambda i: (0, 0)),
        ],
        out_specs=pl.BlockSpec((batch, NUM_TOKENS_PAD, EMBED_DIM), lambda i: (0, 0, 0)),
    )(patches, prep["patch_w"], prep["patch_b"], prep["cls_pos"], prep["pos_patch"])


def pallas_blocks(tok, prep):
    B, n_pad, D = tok.shape

    def wspec(shape):
        return pl.BlockSpec((1,) + shape, lambda d: (d, 0, 0))

    tok_spec = pl.BlockSpec((B, n_pad, D), lambda d: (0, 0, 0))

    # TODO(synk): at real scale add a leading "parallel" batch-tile grid axis so v7x
    #             megacore shards images across its 2 TensorCores.
    return pl.pallas_call(
        functools.partial(_blocks_kernel, batch=B, n_pad=n_pad, n_tok=NUM_TOKENS,
                          num_heads=NUM_HEADS, head_dim=HEAD_DIM,
                          scale=HEAD_DIM ** -0.5, eps=LN_EPS),
        out_shape=jax.ShapeDtypeStruct((B, n_pad, D), jnp.float32),
        grid=(DEPTH,),
        in_specs=[
            tok_spec,                                          # tokens (fetched once)
            wspec((1, D)), wspec((1, D)),                      # ln1 gamma/beta
            wspec((D, 3 * D)), wspec((1, 3 * D)),              # qkv
            wspec((D, D)), wspec((1, D)),                      # proj
            wspec((1, D)),                                     # layerscale 1
            wspec((1, D)), wspec((1, D)),                      # ln2 gamma/beta
            wspec((D, MLP_DIM)), wspec((1, MLP_DIM)),          # fc1
            wspec((MLP_DIM, D)), wspec((1, D)),                # fc2
            wspec((1, D)),                                     # layerscale 2
        ],
        out_specs=tok_spec,
        compiler_params=pltpu.CompilerParams(dimension_semantics=("arbitrary",)),
    )(tok,
      prep["ln1_g"], prep["ln1_b"], prep["qkv_w"], prep["qkv_b"],
      prep["proj_w"], prep["proj_b"], prep["ls1"],
      prep["ln2_g"], prep["ln2_b"], prep["fc1_w"], prep["fc1_b"],
      prep["fc2_w"], prep["fc2_b"], prep["ls2"])


def pallas_norm_head(cls_tok, prep):
    B, D = cls_tok.shape
    out = pl.pallas_call(
        functools.partial(_norm_head_kernel, eps=LN_EPS),
        out_shape=jax.ShapeDtypeStruct((B, HEAD_PAD), jnp.float32),
        grid=(1,),
        in_specs=[
            pl.BlockSpec((B, D), lambda i: (0, 0)),
            pl.BlockSpec((1, D), lambda i: (0, 0)),
            pl.BlockSpec((1, D), lambda i: (0, 0)),
            pl.BlockSpec((D, HEAD_PAD), lambda i: (0, 0)),
            pl.BlockSpec((1, HEAD_PAD), lambda i: (0, 0)),
        ],
        out_specs=pl.BlockSpec((B, HEAD_PAD), lambda i: (0, 0)),
    )(cls_tok, prep["norm_g"], prep["norm_b"], prep["head_w"], prep["head_b"])
    return out[:, :NUM_CLASSES]


# ---------------- one-time parameter prep (outside the jitted hot path) ----------------
def prepare_params(params):
    """bf16 casts, depth stacking, lane/K padding and bias reshapes — done ONCE."""
    blocks = params["blocks"]

    def svec(name, dim):
        return jnp.stack([p[name].reshape(1, dim) for p in blocks], axis=0)   # (DEPTH,1,dim)

    def smat(name):
        return jnp.stack([p[name] for p in blocks], axis=0).astype(jnp.bfloat16)

    patch_w = jnp.zeros((PATCH_DIM_PAD, EMBED_DIM), jnp.float32)
    patch_w = patch_w.at[:PATCH_DIM, :].set(params["patch_w"]).astype(jnp.bfloat16)

    head_w = jnp.zeros((EMBED_DIM, HEAD_PAD), jnp.float32)
    head_w = head_w.at[:, :NUM_CLASSES].set(params["head_w"]).astype(jnp.bfloat16)
    head_b = jnp.zeros((1, HEAD_PAD), jnp.float32).at[:, :NUM_CLASSES].set(
        params["head_b"].reshape(1, NUM_CLASSES))

    return {
        "patch_w": patch_w,
        "patch_b": params["patch_b"].reshape(1, EMBED_DIM),
        "cls_pos": params["cls_token"].reshape(1, EMBED_DIM) + params["pos_embed"][0, 0:1, :],
        "pos_patch": params["pos_embed"][0, 1:, :],
        "ln1_g": svec("ln1_g", EMBED_DIM), "ln1_b": svec("ln1_b", EMBED_DIM),
        "qkv_w": smat("qkv_w"), "qkv_b": svec("qkv_b", 3 * EMBED_DIM),
        "proj_w": smat("proj_w"), "proj_b": svec("proj_b", EMBED_DIM),
        "ls1": svec("ls1", EMBED_DIM),
        "ln2_g": svec("ln2_g", EMBED_DIM), "ln2_b": svec("ln2_b", EMBED_DIM),
        "fc1_w": smat("fc1_w"), "fc1_b": svec("fc1_b", MLP_DIM),
        "fc2_w": smat("fc2_w"), "fc2_b": svec("fc2_b", EMBED_DIM),
        "ls2": svec("ls2", EMBED_DIM),
        "norm_g": params["norm_g"].reshape(1, EMBED_DIM),
        "norm_b": params["norm_b"].reshape(1, EMBED_DIM),
        "head_w": head_w, "head_b": head_b,
    }


# ---------------- model forward (Pallas hot path, tiny JAX glue) ----------------
def vit_forward(x, prep):
    """x: (B, C, H, W) NCHW float32 -> logits (B, NUM_CLASSES)."""
    B = x.shape[0]
    # im2col for the stride=kernel=14 patch conv: per-patch (C, kh, kw) flattening order
    # matches PyTorch Conv2d weight.reshape(D, -1); K padded to a 128 multiple.
    patches = x.reshape(B, IN_CH, GRID_SIZE, PATCH, GRID_SIZE, PATCH)
    patches = patches.transpose(0, 2, 4, 1, 3, 5).reshape(B, NUM_PATCHES, PATCH_DIM)
    patches = jnp.pad(patches, ((0, 0), (0, 0), (0, PATCH_DIM_PAD - PATCH_DIM)))
    patches = patches.reshape(B * NUM_PATCHES, PATCH_DIM_PAD)

    tok = pallas_embed(patches, prep, B)            # (B, N_pad, D): cls + pos + pad fused
    tok = pallas_blocks(tok, prep)                  # all DEPTH blocks in one pallas_call
    return pallas_norm_head(tok[:, 0, :], prep)     # x_norm_clstoken -> head


# ---------------- deterministic parameter init ----------------
def init_params(key):
    keys = jax.random.split(key, 4 + DEPTH)

    def w(k, shape):
        return (0.02 * jax.random.normal(k, shape)).astype(jnp.float32)

    params = {
        "patch_w": w(keys[0], (PATCH_DIM, EMBED_DIM)),
        "patch_b": jnp.zeros((EMBED_DIM,), jnp.float32),
        "cls_token": w(keys[1], (1, 1, EMBED_DIM)),
        "pos_embed": w(keys[2], (1, NUM_TOKENS, EMBED_DIM)),
        "norm_g": jnp.ones((EMBED_DIM,), jnp.float32),
        "norm_b": jnp.zeros((EMBED_DIM,), jnp.float32),
        "head_w": w(keys[3], (EMBED_DIM, NUM_CLASSES)),
        "head_b": jnp.zeros((NUM_CLASSES,), jnp.float32),
        "blocks": [],
    }
    for d in range(DEPTH):
        bk = jax.random.split(keys[4 + d], 4)
        params["blocks"].append({
            "ln1_g": jnp.ones((EMBED_DIM,), jnp.float32),
            "ln1_b": jnp.zeros((EMBED_DIM,), jnp.float32),
            "qkv_w": w(bk[0], (EMBED_DIM, 3 * EMBED_DIM)),
            "qkv_b": jnp.zeros((3 * EMBED_DIM,), jnp.float32),
            "proj_w": w(bk[1], (EMBED_DIM, EMBED_DIM)),
            "proj_b": jnp.zeros((EMBED_DIM,), jnp.float32),
            # DINOv2 LayerScale (ones here so the synthetic forward exercises the
            # full block numerically; real checkpoints carry learned gammas).
            "ls1": jnp.ones((EMBED_DIM,), jnp.float32),
            "ln2_g": jnp.ones((EMBED_DIM,), jnp.float32),
            "ln2_b": jnp.zeros((EMBED_DIM,), jnp.float32),
            "fc1_w": w(bk[2], (EMBED_DIM, MLP_DIM)),
            "fc1_b": jnp.zeros((MLP_DIM,), jnp.float32),
            "fc2_w": w(bk[3], (MLP_DIM, EMBED_DIM)),
            "fc2_b": jnp.zeros((EMBED_DIM,), jnp.float32),
            "ls2": jnp.ones((EMBED_DIM,), jnp.float32),
        })
    return params


# ---------------- pure-JAX f32 reference (correctness check) ----------------
def reference_forward(x, params):
    B = x.shape[0]
    patches = x.reshape(B, IN_CH, GRID_SIZE, PATCH, GRID_SIZE, PATCH)
    patches = patches.transpose(0, 2, 4, 1, 3, 5).reshape(B, NUM_PATCHES, PATCH_DIM)
    tok = patches @ params["patch_w"] + params["patch_b"]
    cls = jnp.broadcast_to(params["cls_token"].reshape(1, 1, EMBED_DIM), (B, 1, EMBED_DIM))
    tok = jnp.concatenate([cls, tok], axis=1) + params["pos_embed"]

    def ln(t, g, b):
        m = t.mean(-1, keepdims=True)
        v = ((t - m) ** 2).mean(-1, keepdims=True)
        return (t - m) * jax.lax.rsqrt(v + LN_EPS) * g + b

    for p in params["blocks"]:
        h = ln(tok, p["ln1_g"], p["ln1_b"])
        qkv = h @ p["qkv_w"] + p["qkv_b"]
        qkv = qkv.reshape(B, NUM_TOKENS, 3, NUM_HEADS, HEAD_DIM).transpose(2, 0, 3, 1, 4)
        q, k, v = qkv[0] * (HEAD_DIM ** -0.5), qkv[1], qkv[2]
        s = jnp.einsum("bhqd,bhkd->bhqk", q, k)
        a = jax.nn.softmax(s, axis=-1)
        o = jnp.einsum("bhqk,bhkd->bhqd", a, v)
        o = o.transpose(0, 2, 1, 3).reshape(B, NUM_TOKENS, EMBED_DIM)
        tok = tok + p["ls1"] * (o @ p["proj_w"] + p["proj_b"])
        h = ln(tok, p["ln2_g"], p["ln2_b"])
        h = jax.nn.gelu(h @ p["fc1_w"] + p["fc1_b"], approximate=False)  # exact erf-GELU
        tok = tok + p["ls2"] * (h @ p["fc2_w"] + p["fc2_b"])
    tok = ln(tok, params["norm_g"], params["norm_b"])
    return tok[:, 0, :] @ params["head_w"] + params["head_b"]


if __name__ == "__main__":
    key = jax.random.PRNGKey(0)
    pkey, xkey = jax.random.split(key)
    params = init_params(pkey)
    prep = prepare_params(params)            # one-time weight prep, outside the hot path
    x = jax.random.normal(xkey, (2, IN_CH, IMG, IMG), dtype=jnp.float32)

    fwd = jax.jit(vit_forward)
    logits = jax.block_until_ready(fwd(x, prep))
    assert logits.shape == (2, NUM_CLASSES)
    assert bool(jnp.all(jnp.isfinite(logits)))

    ref = reference_forward(x, params)
    err = float(jnp.max(jnp.abs(logits - ref)))
    assert jnp.allclose(logits, ref, rtol=2e-2, atol=2e-2), err

    print("KERNEL_OK")
</pallas_src>

<mosaic_0001>
module attributes {stable_mosaic.version = 11 : i64} {
  func.func @_embed_kernel(%arg0: i32, %arg1: memref<8x640xf32, #tpu.memory_space<vmem>>, %arg2: memref<640x128xbf16, #tpu.memory_space<vmem>>, %arg3: memref<1x128xf32, #tpu.memory_space<vmem>>, %arg4: memref<1x128xf32, #tpu.memory_space<vmem>>, %arg5: memref<4x128xf32, #tpu.memory_space<vmem>>, %arg6: memref<2x8x128xf32, #tpu.memory_space<vmem>>) attributes {dimension_semantics = [#tpu.dimension_semantics<arbitrary>], iteration_bounds = array<i64: 1>, scalar_prefetch = 0 : i64, scratch_operands = 0 : i64, tpu.core_type = #tpu.core_type<tc>, window_params = [{pipeline_mode = #tpu.pipeline_mode<synchronous>, transform_indices = @transform_0, window_bounds = array<i64: 8, 640>}, {pipeline_mode = #tpu.pipeline_mode<synchronous>, transform_indices = @transform_1, window_bounds = array<i64: 640, 128>}, {pipeline_mode = #tpu.pipeline_mode<synchronous>, transform_indices = @transform_2, window_bounds = array<i64: 1, 128>}, {pipeline_mode = #tpu.pipeline_mode<synchronous>, transform_indices = @transform_3, window_bounds = array<i64: 1, 128>}, {pipeline_mode = #tpu.pipeline_mode<synchronous>, transform_indices = @transform_4, window_bounds = array<i64: 4, 128>}, {pipeline_mode = #tpu.pipeline_mode<synchronous>, transform_indices = @transform_5, window_bounds = array<i64: 2, 8, 128>}]} {
    %c0 = arith.constant 0 : index
    %c0_0 = arith.constant 0 : index
    %0 = vector.load %arg1[%c0, %c0_0] : memref<8x640xf32, #tpu.memory_space<vmem>>, vector<8x640xf32>
    %1 = arith.truncf %0 : vector<8x640xf32> to vector<8x640xbf16>
    %c0_1 = arith.constant 0 : index
    %c0_2 = arith.constant 0 : index
    %2 = vector.load %arg2[%c0_1, %c0_2] : memref<640x128xbf16, #tpu.memory_space<vmem>>, vector<640x128xbf16>
    %cst = arith.constant dense<0.000000e+00> : vector<8x128xf32>
    %3 = tpu.matmul %1, %2, %cst {dimension_numbers = #tpu.dot_dimension_numbers<[1], [0], [0], [1], [0, 0, 1, 1], [], []>} : vector<8x640xbf16>, vector<640x128xbf16>, vector<8x128xf32> -> vector<8x128xf32>
    %c0_3 = arith.constant 0 : index
    %c0_4 = arith.constant 0 : index
    %4 = vector.load %arg3[%c0_3, %c0_4] : memref<1x128xf32, #tpu.memory_space<vmem>>, vector<1x128xf32>
    %5 = vector.broadcast %4 : vector<1x128xf32> to vector<8x128xf32>
    %6 = arith.addf %3, %5 : vector<8x128xf32>
    %cst_5 = arith.constant 0.000000e+00 : f32
    %7 = vector.broadcast %cst_5 : f32 to vector<3x128xf32>
    %c0_6 = arith.constant 0 : index
    %c0_7 = arith.constant 0 : index
    %8 = vector.load %arg4[%c0_6, %c0_7] : memref<1x128xf32, #tpu.memory_space<vmem>>, vector<1x128xf32>
    %9 = vector.extract_strided_slice %6 {offsets = [0, 0], sizes = [4, 128], strides = [1, 1]} : vector<8x128xf32> to vector<4x128xf32>
    %c0_8 = arith.constant 0 : index
    %c0_9 = arith.constant 0 : index
    %10 = vector.load %arg5[%c0_8, %c0_9] : memref<4x128xf32, #tpu.memory_space<vmem>>, vector<4x128xf32>
    %11 = arith.addf %9, %10 : vector<4x128xf32>
    %12 = tpu.concatenate %8, %11, %7 in 0 : vector<1x128xf32>, vector<4x128xf32>, vector<3x128xf32> -> vector<8x128xf32>
    %c0_10 = arith.constant 0 : index
    %c0_11 = arith.constant 0 : index
    %c0_12 = arith.constant 0 : index
    %13 = vector.load %arg6[%c0_10, %c0_11, %c0_12] : memref<2x8x128xf32, #tpu.memory_space<vmem>>, vector<1x8x128xf32>
    %14 = vector.shape_cast %13 : vector<1x8x128xf32> to vector<8x128xf32>
    %15 = vector.shape_cast %12 : vector<8x128xf32> to vector<1x8x128xf32>
    tpu.vector_store %arg6[%c0_10, %c0_11, %c0_12], %15 {strides = array<i32>} : memref<2x8x128xf32, #tpu.memory_space<vmem>>, vector<1x8x128xf32>,
    %c0_13 = arith.constant 0 : index
    %c0_14 = arith.constant 0 : index
    %16 = vector.load %arg4[%c0_13, %c0_14] : memref<1x128xf32, #tpu.memory_space<vmem>>, vector<1x128xf32>
    %17 = vector.extract_strided_slice %6 {offsets = [4, 0], sizes = [4, 128], strides = [1, 1]} : vector<8x128xf32> to vector<4x128xf32>
    %c0_15 = arith.constant 0 : index
    %c0_16 = arith.constant 0 : index
    %18 = vector.load %arg5[%c0_15, %c0_16] : memref<4x128xf32, #tpu.memory_space<vmem>>, vector<4x128xf32>
    %19 = arith.addf %17, %18 : vector<4x128xf32>
    %20 = tpu.concatenate %16, %19, %7 in 0 : vector<1x128xf32>, vector<4x128xf32>, vector<3x128xf32> -> vector<8x128xf32>
    %c1 = arith.constant 1 : index
    %c0_17 = arith.constant 0 : index
    %c0_18 = arith.constant 0 : index
    %21 = vector.load %arg6[%c1, %c0_17, %c0_18] : memref<2x8x128xf32, #tpu.memory_space<vmem>>, vector<1x8x128xf32>
    %22 = vector.shape_cast %21 : vector<1x8x128xf32> to vector<8x128xf32>
    %23 = vector.shape_cast %20 : vector<8x128xf32> to vector<1x8x128xf32>
    tpu.vector_store %arg6[%c1, %c0_17, %c0_18], %23 {strides = array<i32>} : memref<2x8x128xf32, #tpu.memory_space<vmem>>, vector<1x8x128xf32>,
    return
  }
  func.func @transform_0(%arg0: i32) -> (i32, i32) {
    %c0_i32 = arith.constant 0 : i32
    %c0_i32_0 = arith.constant 0 : i32
    %c0_i32_1 = arith.constant 0 : i32
    return %c0_i32, %c0_i32_0 : i32, i32
  }
  func.func @transform_1(%arg0: i32) -> (i32, i32) {
    %c0_i32 = arith.constant 0 : i32
    %c0_i32_0 = arith.constant 0 : i32
    %c0_i32_1 = arith.constant 0 : i32
    return %c0_i32, %c0_i32_0 : i32, i32
  }
  func.func @transform_2(%arg0: i32) -> (i32, i32) {
    %c0_i32 = arith.constant 0 : i32
    %c0_i32_0 = arith.constant 0 : i32
    %c0_i32_1 = arith.constant 0 : i32
    return %c0_i32, %c0_i32_0 : i32, i32
  }
  func.func @transform_3(%arg0: i32) -> (i32, i32) {
    %c0_i32 = arith.constant 0 : i32
    %c0_i32_0 = arith.constant 0 : i32
    %c0_i32_1 = arith.constant 0 : i32
    return %c0_i32, %c0_i32_0 : i32, i32
  }
  func.func @transform_4(%arg0: i32) -> (i32, i32) {
    %c0_i32 = arith.constant 0 : i32
    %c0_i32_0 = arith.constant 0 : i32
    %c0_i32_1 = arith.constant 0 : i32
    return %c0_i32, %c0_i32_0 : i32, i32
  }
  func.func @transform_5(%arg0: i32) -> (i32, i32, i32) {
    %c0_i32 = arith.constant 0 : i32
    %c0_i32_0 = arith.constant 0 : i32
    %c0_i32_1 = arith.constant 0 : i32
    %c0_i32_2 = arith.constant 0 : i32
    return %c0_i32, %c0_i32_0, %c0_i32_1 : i32, i32, i32
  }
}

module attributes {stable_mosaic.version = 11 : i64} {
  func.func @_blocks_kernel(%arg0: i32, %arg1: memref<2x8x128xf32, #tpu.memory_space<vmem>>, %arg2: memref<1x1x128xf32, #tpu.memory_space<vmem>>, %arg3: memref<1x1x128xf32, #tpu.memory_space<vmem>>, %arg4: memref<1x128x384xbf16, #tpu.memory_space<vmem>>, %arg5: memref<1x1x384xf32, #tpu.memory_space<vmem>>, %arg6: memref<1x128x128xbf16, #tpu.memory_space<vmem>>, %arg7: memref<1x1x128xf32, #tpu.memory_space<vmem>>, %arg8: memref<1x1x128xf32, #tpu.memory_space<vmem>>, %arg9: memref<1x1x128xf32, #tpu.memory_space<vmem>>, %arg10: memref<1x1x128xf32, #tpu.memory_space<vmem>>, %arg11: memref<1x128x512xbf16, #tpu.memory_space<vmem>>, %arg12: memref<1x1x512xf32, #tpu.memory_space<vmem>>, %arg13: memref<1x512x128xbf16, #tpu.memory_space<vmem>>, %arg14: memref<1x1x128xf32, #tpu.memory_space<vmem>>, %arg15: memref<1x1x128xf32, #tpu.memory_space<vmem>>, %arg16: memref<2x8x128xf32, #tpu.memory_space<vmem>>) attributes {dimension_semantics = [#tpu.dimension_semantics<arbitrary>], iteration_bounds = array<i64: 2>, scalar_prefetch = 0 : i64, scratch_operands = 0 : i64, tpu.core_type = #tpu.core_type<tc>, window_params = [{pipeline_mode = #tpu.pipeline_mode<synchronous>, transform_indices = @transform_0, window_bounds = array<i64: 2, 8, 128>}, {transform_indices = @transform_1, window_bounds = array<i64: 1, 1, 128>}, {transform_indices = @transform_2, window_bounds = array<i64: 1, 1, 128>}, {transform_indices = @transform_3, window_bounds = array<i64: 1, 128, 384>}, {transform_indices = @transform_4, window_bounds = array<i64: 1, 1, 384>}, {transform_indices = @transform_5, window_bounds = array<i64: 1, 128, 128>}, {transform_indices = @transform_6, window_bounds = array<i64: 1, 1, 128>}, {transform_indices = @transform_7, window_bounds = array<i64: 1, 1, 128>}, {transform_indices = @transform_8, window_bounds = array<i64: 1, 1, 128>}, {transform_indices = @transform_9, window_bounds = array<i64: 1, 1, 128>}, {transform_indices = @transform_10, window_bounds = array<i64: 1, 128, 512>}, {transform_indices = @transform_11, window_bounds = array<i64: 1, 1, 512>}, {transform_indices = @transform_12, window_bounds = array<i64: 1, 512, 128>}, {transform_indices = @transform_13, window_bounds = array<i64: 1, 1, 128>}, {transform_indices = @transform_14, window_bounds = array<i64: 1, 1, 128>}, {pipeline_mode = #tpu.pipeline_mode<synchronous>, transform_indices = @transform_15, window_bounds = array<i64: 2, 8, 128>}]} {
    %c0_i32 = arith.constant 0 : i32
    %0 = arith.cmpi eq, %arg0, %c0_i32 : i32
    %1 = arith.extui %0 : i1 to i32
    %c0_i32_0 = arith.constant 0 : i32
    %2 = arith.cmpi ne, %1, %c0_i32_0 : i32
    scf.if %2 {
      %c0_98 = arith.constant 0 : index
      %c0_99 = arith.constant 0 : index
      %c0_100 = arith.constant 0 : index
      %238 = vector.load %arg1[%c0_98, %c0_99, %c0_100] : memref<2x8x128xf32, #tpu.memory_space<vmem>>, vector<2x8x128xf32>
      %c0_101 = arith.constant 0 : index
      %c0_102 = arith.constant 0 : index
      %c0_103 = arith.constant 0 : index
      %239 = vector.load %arg16[%c0_101, %c0_102, %c0_103] : memref<2x8x128xf32, #tpu.memory_space<vmem>>, vector<2x8x128xf32>
      tpu.vector_store %arg16[%c0_101, %c0_102, %c0_103], %238 {strides = array<i32>} : memref<2x8x128xf32, #tpu.memory_space<vmem>>, vector<2x8x128xf32>,
    } else {
    }
    %c0 = arith.constant 0 : index
    %c0_1 = arith.constant 0 : index
    %c0_2 = arith.constant 0 : index
    %3 = vector.load %arg16[%c0, %c0_1, %c0_2] : memref<2x8x128xf32, #tpu.memory_space<vmem>>, vector<2x8x128xf32>
    %4 = vector.shape_cast %3 : vector<2x8x128xf32> to vector<16x128xf32>
    %c0_3 = arith.constant 0 : index
    %c0_4 = arith.constant 0 : index
    %c0_5 = arith.constant 0 : index
    %5 = vector.load %arg2[%c0_3, %c0_4, %c0_5] : memref<1x1x128xf32, #tpu.memory_space<vmem>>, vector<1x1x128xf32>
    %6 = vector.shape_cast %5 : vector<1x1x128xf32> to vector<1x128xf32>
    %c0_6 = arith.constant 0 : index
    %c0_7 = arith.constant 0 : index
    %c0_8 = arith.constant 0 : index
    %7 = vector.load %arg3[%c0_6, %c0_7, %c0_8] : memref<1x1x128xf32, #tpu.memory_space<vmem>>, vector<1x1x128xf32>
    %8 = vector.shape_cast %7 : vector<1x1x128xf32> to vector<1x128xf32>
    %cst = arith.constant dense<0.000000e+00> : vector<16xf32>
    %9 = vector.multi_reduction <add>, %4, %cst [1] : vector<16x128xf32> to vector<16xf32>
    %10 = vector.shape_cast %9 : vector<16xf32> to vector<16x1xf32>
    %cst_9 = arith.constant 1.280000e+02 : f32
    %11 = vector.broadcast %cst_9 : f32 to vector<16x1xf32>
    %12 = arith.divf %10, %11 : vector<16x1xf32>
    %13 = vector.broadcast %12 : vector<16x1xf32> to vector<16x128xf32>
    %14 = arith.subf %4, %13 : vector<16x128xf32>
    %15 = arith.mulf %14, %14 : vector<16x128xf32>
    %cst_10 = arith.constant dense<0.000000e+00> : vector<16xf32>
    %16 = vector.multi_reduction <add>, %15, %cst_10 [1] : vector<16x128xf32> to vector<16xf32>
    %17 = vector.shape_cast %16 : vector<16xf32> to vector<16x1xf32>
    %cst_11 = arith.constant 1.280000e+02 : f32
    %18 = vector.broadcast %cst_11 : f32 to vector<16x1xf32>
    %19 = arith.divf %17, %18 : vector<16x1xf32>
    %cst_12 = arith.constant 9.99999997E-7 : f32
    %20 = vector.broadcast %cst_12 : f32 to vector<16x1xf32>
    %21 = arith.addf %19, %20 : vector<16x1xf32>
    %22 = math.rsqrt %21 : vector<16x1xf32>
    %23 = vector.broadcast %22 : vector<16x1xf32> to vector<16x128xf32>
    %24 = arith.mulf %14, %23 : vector<16x128xf32>
    %25 = vector.broadcast %6 : vector<1x128xf32> to vector<16x128xf32>
    %26 = arith.mulf %24, %25 : vector<16x128xf32>
    %27 = vector.broadcast %8 : vector<1x128xf32> to vector<16x128xf32>
    %28 = arith.addf %26, %27 : vector<16x128xf32>
    %29 = arith.truncf %28 : vector<16x128xf32> to vector<16x128xbf16>
    %c0_13 = arith.constant 0 : index
    %c0_14 = arith.constant 0 : index
    %c0_15 = arith.constant 0 : index
    %30 = vector.load %arg4[%c0_13, %c0_14, %c0_15] : memref<1x128x384xbf16, #tpu.memory_space<vmem>>, vector<1x128x384xbf16>
    %31 = vector.shape_cast %30 : vector<1x128x384xbf16> to vector<128x384xbf16>
    %cst_16 = arith.constant dense<0.000000e+00> : vector<16x384xf32>
    %32 = tpu.matmul %29, %31, %cst_16 {dimension_numbers = #tpu.dot_dimension_numbers<[1], [0], [0], [1], [0, 0, 1, 1], [], []>} : vector<16x128xbf16>, vector<128x384xbf16>, vector<16x384xf32> -> vector<16x384xf32>
    %c0_17 = arith.constant 0 : index
    %c0_18 = arith.constant 0 : index
    %c0_19 = arith.constant 0 : index
    %33 = vector.load %arg5[%c0_17, %c0_18, %c0_19] : memref<1x1x384xf32, #tpu.memory_space<vmem>>, vector<1x1x384xf32>
    %34 = vector.shape_cast %33 : vector<1x1x384xf32> to vector<1x384xf32>
    %35 = vector.broadcast %34 : vector<1x384xf32> to vector<16x384xf32>
    %36 = arith.addf %32, %35 : vector<16x384xf32>
    %37 = tpu.iota {dimensions = array<i32: 1>} : vector<1x8xi32>
    %c5_i32 = arith.constant 5 : i32
    %38 = vector.broadcast %c5_i32 : i32 to vector<1x8xi32>
    %39 = arith.cmpi slt, %37, %38 : vector<1x8xi32>
    %cst_20 = arith.constant 0.000000e+00 : f32
    %cst_21 = arith.constant -1.000000e+30 : f32
    %40 = vector.broadcast %cst_20 : f32 to vector<1x8xf32>
    %41 = vector.broadcast %cst_21 : f32 to vector<1x8xf32>
    %42 = arith.select %39, %40, %41 : vector<1x8xi1>, vector<1x8xf32>
    %43 = vector.extract_strided_slice %36 {offsets = [0, 0], sizes = [8, 64], strides = [1, 1]} : vector<16x384xf32> to vector<8x64xf32>
    %cst_22 = arith.constant 1.250000e-01 : f32
    %44 = vector.broadcast %cst_22 : f32 to vector<8x64xf32>
    %45 = arith.mulf %43, %44 : vector<8x64xf32>
    %46 = vector.extract_strided_slice %36 {offsets = [0, 128], sizes = [8, 64], strides = [1, 1]} : vector<16x384xf32> to vector<8x64xf32>
    %47 = vector.extract_strided_slice %36 {offsets = [0, 256], sizes = [8, 64], strides = [1, 1]} : vector<16x384xf32> to vector<8x64xf32>
    %48 = arith.truncf %45 : vector<8x64xf32> to vector<8x64xbf16>
    %49 = arith.truncf %46 : vector<8x64xf32> to vector<8x64xbf16>
    %cst_23 = arith.constant dense<0.000000e+00> : vector<8x8xf32>
    %50 = tpu.matmul %48, %49, %cst_23 {dimension_numbers = #tpu.dot_dimension_numbers<[1], [1], [0], [0], [0, 0, 1, 0], [], []>} : vector<8x64xbf16>, vector<8x64xbf16>, vector<8x8xf32> -> vector<8x8xf32>
    %51 = vector.broadcast %42 : vector<1x8xf32> to vector<8x8xf32>
    %52 = arith.addf %50, %51 : vector<8x8xf32>
    %cst_24 = arith.constant dense<0xFF800000> : vector<8xf32>
    %53 = vector.multi_reduction <maximumf>, %52, %cst_24 [1] : vector<8x8xf32> to vector<8xf32>
    %54 = vector.shape_cast %53 : vector<8xf32> to vector<8x1xf32>
    %55 = vector.broadcast %54 : vector<8x1xf32> to vector<8x8xf32>
    %56 = arith.subf %52, %55 : vector<8x8xf32>
    %57 = math.exp %56 : vector<8x8xf32>
    %cst_25 = arith.constant dense<0.000000e+00> : vector<8xf32>
    %58 = vector.multi_reduction <add>, %57, %cst_25 [1] : vector<8x8xf32> to vector<8xf32>
    %59 = vector.shape_cast %58 : vector<8xf32> to vector<8x1xf32>
    %60 = tpu.reciprocal %59 {approx = true} : vector<8x1xf32> -> vector<8x1xf32>
    %61 = vector.broadcast %60 : vector<8x1xf32> to vector<8x8xf32>
    %62 = arith.mulf %57, %61 : vector<8x8xf32>
    %63 = arith.truncf %62 : vector<8x8xf32> to vector<8x8xbf16>
    %64 = arith.truncf %47 : vector<8x64xf32> to vector<8x64xbf16>
    %cst_26 = arith.constant dense<0.000000e+00> : vector<8x64xf32>
    %65 = tpu.matmul %63, %64, %cst_26 {dimension_numbers = #tpu.dot_dimension_numbers<[1], [0], [0], [1], [0, 0, 1, 1], [], []>} : vector<8x8xbf16>, vector<8x64xbf16>, vector<8x64xf32> -> vector<8x64xf32>
    %66 = vector.extract_strided_slice %36 {offsets = [0, 64], sizes = [8, 64], strides = [1, 1]} : vector<16x384xf32> to vector<8x64xf32>
    %cst_27 = arith.constant 1.250000e-01 : f32
    %67 = vector.broadcast %cst_27 : f32 to vector<8x64xf32>
    %68 = arith.mulf %66, %67 : vector<8x64xf32>
    %69 = vector.extract_strided_slice %36 {offsets = [0, 192], sizes = [8, 64], strides = [1, 1]} : vector<16x384xf32> to vector<8x64xf32>
    %70 = vector.extract_strided_slice %36 {offsets = [0, 320], sizes = [8, 64], strides = [1, 1]} : vector<16x384xf32> to vector<8x64xf32>
    %71 = arith.truncf %68 : vector<8x64xf32> to vector<8x64xbf16>
    %72 = arith.truncf %69 : vector<8x64xf32> to vector<8x64xbf16>
    %cst_28 = arith.constant dense<0.000000e+00> : vector<8x8xf32>
    %73 = tpu.matmul %71, %72, %cst_28 {dimension_numbers = #tpu.dot_dimension_numbers<[1], [1], [0], [0], [0, 0, 1, 0], [], []>} : vector<8x64xbf16>, vector<8x64xbf16>, vector<8x8xf32> -> vector<8x8xf32>
    %74 = vector.broadcast %42 : vector<1x8xf32> to vector<8x8xf32>
    %75 = arith.addf %73, %74 : vector<8x8xf32>
    %cst_29 = arith.constant dense<0xFF800000> : vector<8xf32>
    %76 = vector.multi_reduction <maximumf>, %75, %cst_29 [1] : vector<8x8xf32> to vector<8xf32>
    %77 = vector.shape_cast %76 : vector<8xf32> to vector<8x1xf32>
    %78 = vector.broadcast %77 : vector<8x1xf32> to vector<8x8xf32>
    %79 = arith.subf %75, %78 : vector<8x8xf32>
    %80 = math.exp %79 : vector<8x8xf32>
    %cst_30 = arith.constant dense<0.000000e+00> : vector<8xf32>
    %81 = vector.multi_reduction <add>, %80, %cst_30 [1] : vector<8x8xf32> to vector<8xf32>
    %82 = vector.shape_cast %81 : vector<8xf32> to vector<8x1xf32>
    %83 = tpu.reciprocal %82 {approx = true} : vector<8x1xf32> -> vector<8x1xf32>
    %84 = vector.broadcast %83 : vector<8x1xf32> to vector<8x8xf32>
    %85 = arith.mulf %80, %84 : vector<8x8xf32>
    %86 = arith.truncf %85 : vector<8x8xf32> to vector<8x8xbf16>
    %87 = arith.truncf %70 : vector<8x64xf32> to vector<8x64xbf16>
    %cst_31 = arith.constant dense<0.000000e+00> : vector<8x64xf32>
    %88 = tpu.matmul %86, %87, %cst_31 {dimension_numbers = #tpu.dot_dimension_numbers<[1], [0], [0], [1], [0, 0, 1, 1], [], []>} : vector<8x8xbf16>, vector<8x64xbf16>, vector<8x64xf32> -> vector<8x64xf32>
    %89 = tpu.concatenate %65, %88 in 1 : vector<8x64xf32>, vector<8x64xf32> -> vector<8x128xf32>
    %90 = vector.extract_strided_slice %36 {offsets = [8, 0], sizes = [8, 64], strides = [1, 1]} : vector<16x384xf32> to vector<8x64xf32>
    %cst_32 = arith.constant 1.250000e-01 : f32
    %91 = vector.broadcast %cst_32 : f32 to vector<8x64xf32>
    %92 = arith.mulf %90, %91 : vector<8x64xf32>
    %93 = vector.extract_strided_slice %36 {offsets = [8, 128], sizes = [8, 64], strides = [1, 1]} : vector<16x384xf32> to vector<8x64xf32>
    %94 = vector.extract_strided_slice %36 {offsets = [8, 256], sizes = [8, 64], strides = [1, 1]} : vector<16x384xf32> to vector<8x64xf32>
    %95 = arith.truncf %92 : vector<8x64xf32> to vector<8x64xbf16>
    %96 = arith.truncf %93 : vector<8x64xf32> to vector<8x64xbf16>
    %cst_33 = arith.constant dense<0.000000e+00> : vector<8x8xf32>
    %97 = tpu.matmul %95, %96, %cst_33 {dimension_numbers = #tpu.dot_dimension_numbers<[1], [1], [0], [0], [0, 0, 1, 0], [], []>} : vector<8x64xbf16>, vector<8x64xbf16>, vector<8x8xf32> -> vector<8x8xf32>
    %98 = vector.broadcast %42 : vector<1x8xf32> to vector<8x8xf32>
    %99 = arith.addf %97, %98 : vector<8x8xf32>
    %cst_34 = arith.constant dense<0xFF800000> : vector<8xf32>
    %100 = vector.multi_reduction <maximumf>, %99, %cst_34 [1] : vector<8x8xf32> to vector<8xf32>
    %101 = vector.shape_cast %100 : vector<8xf32> to vector<8x1xf32>
    %102 = vector.broadcast %101 : vector<8x1xf32> to vector<8x8xf32>
    %103 = arith.subf %99, %102 : vector<8x8xf32>
    %104 = math.exp %103 : vector<8x8xf32>
    %cst_35 = arith.constant dense<0.000000e+00> : vector<8xf32>
    %105 = vector.multi_reduction <add>, %104, %cst_35 [1] : vector<8x8xf32> to vector<8xf32>
    %106 = vector.shape_cast %105 : vector<8xf32> to vector<8x1xf32>
    %107 = tpu.reciprocal %106 {approx = true} : vector<8x1xf32> -> vector<8x1xf32>
    %108 = vector.broadcast %107 : vector<8x1xf32> to vector<8x8xf32>
    %109 = arith.mulf %104, %108 : vector<8x8xf32>
    %110 = arith.truncf %109 : vector<8x8xf32> to vector<8x8xbf16>
    %111 = arith.truncf %94 : vector<8x64xf32> to vector<8x64xbf16>
    %cst_36 = arith.constant dense<0.000000e+00> : vector<8x64xf32>
    %112 = tpu.matmul %110, %111, %cst_36 {dimension_numbers = #tpu.dot_dimension_numbers<[1], [0], [0], [1], [0, 0, 1, 1], [], []>} : vector<8x8xbf16>, vector<8x64xbf16>, vector<8x64xf32> -> vector<8x64xf32>
    %113 = vector.extract_strided_slice %36 {offsets = [8, 64], sizes = [8, 64], strides = [1, 1]} : vector<16x384xf32> to vector<8x64xf32>
    %cst_37 = arith.constant 1.250000e-01 : f32
    %114 = vector.broadcast %cst_37 : f32 to vector<8x64xf32>
    %115 = arith.mulf %113, %114 : vector<8x64xf32>
    %116 = vector.extract_strided_slice %36 {offsets = [8, 192], sizes = [8, 64], strides = [1, 1]} : vector<16x384xf32> to vector<8x64xf32>
    %117 = vector.extract_strided_slice %36 {offsets = [8, 320], sizes = [8, 64], strides = [1, 1]} : vector<16x384xf32> to vector<8x64xf32>
    %118 = arith.truncf %115 : vector<8x64xf32> to vector<8x64xbf16>
    %119 = arith.truncf %116 : vector<8x64xf32> to vector<8x64xbf16>
    %cst_38 = arith.constant dense<0.000000e+00> : vector<8x8xf32>
    %120 = tpu.matmul %118, %119, %cst_38 {dimension_numbers = #tpu.dot_dimension_numbers<[1], [1], [0], [0], [0, 0, 1, 0], [], []>} : vector<8x64xbf16>, vector<8x64xbf16>, vector<8x8xf32> -> vector<8x8xf32>
    %121 = vector.broadcast %42 : vector<1x8xf32> to vector<8x8xf32>
    %122 = arith.addf %120, %121 : vector<8x8xf32>
    %cst_39 = arith.constant dense<0xFF800000> : vector<8xf32>
    %123 = vector.multi_reduction <maximumf>, %122, %cst_39 [1] : vector<8x8xf32> to vector<8xf32>
    %124 = vector.shape_cast %123 : vector<8xf32> to vector<8x1xf32>
    %125 = vector.broadcast %124 : vector<8x1xf32> to vector<8x8xf32>
    %126 = arith.subf %122, %125 : vector<8x8xf32>
    %127 = math.exp %126 : vector<8x8xf32>
    %cst_40 = arith.constant dense<0.000000e+00> : vector<8xf32>
    %128 = vector.multi_reduction <add>, %127, %cst_40 [1] : vector<8x8xf32> to vector<8xf32>
    %129 = vector.shape_cast %128 : vector<8xf32> to vector<8x1xf32>
    %130 = tpu.reciprocal %129 {approx = true} : vector<8x1xf32> -> vector<8x1xf32>
    %131 = vector.broadcast %130 : vector<8x1xf32> to vector<8x8xf32>
    %132 = arith.mulf %127, %131 : vector<8x8xf32>
    %133 = arith.truncf %132 : vector<8x8xf32> to vector<8x8xbf16>
    %134 = arith.truncf %117 : vector<8x64xf32> to vector<8x64xbf16>
    %cst_41 = arith.constant dense<0.000000e+00> : vector<8x64xf32>
    %135 = tpu.matmul %133, %134, %cst_41 {dimension_numbers = #tpu.dot_dimension_numbers<[1], [0], [0], [1], [0, 0, 1, 1], [], []>} : vector<8x8xbf16>, vector<8x64xbf16>, vector<8x64xf32> -> vector<8x64xf32>
    %136 = tpu.concatenate %112, %135 in 1 : vector<8x64xf32>, vector<8x64xf32> -> vector<8x128xf32>
    %137 = tpu.concatenate %89, %136 in 0 : vector<8x128xf32>, vector<8x128xf32> -> vector<16x128xf32>
    %138 = arith.truncf %137 : vector<16x128xf32> to vector<16x128xbf16>
    %c0_42 = arith.constant 0 : index
    %c0_43 = arith.constant 0 : index
    %c0_44 = arith.constant 0 : index
    %139 = vector.load %arg6[%c0_42, %c0_43, %c0_44] : memref<1x128x128xbf16, #tpu.memory_space<vmem>>, vector<1x128x128xbf16>
    %140 = vector.shape_cast %139 : vector<1x128x128xbf16> to vector<128x128xbf16>
    %cst_45 = arith.constant dense<0.000000e+00> : vector<16x128xf32>
    %141 = tpu.matmul %138, %140, %cst_45 {dimension_numbers = #tpu.dot_dimension_numbers<[1], [0], [0], [1], [0, 0, 1, 1], [], []>} : vector<16x128xbf16>, vector<128x128xbf16>, vector<16x128xf32> -> vector<16x128xf32>
    %c0_46 = arith.constant 0 : index
    %c0_47 = arith.constant 0 : index
    %c0_48 = arith.constant 0 : index
    %142 = vector.load %arg7[%c0_46, %c0_47, %c0_48] : memref<1x1x128xf32, #tpu.memory_space<vmem>>, vector<1x1x128xf32>
    %143 = vector.shape_cast %142 : vector<1x1x128xf32> to vector<1x128xf32>
    %144 = vector.broadcast %143 : vector<1x128xf32> to vector<16x128xf32>
    %145 = arith.addf %141, %144 : vector<16x128xf32>
    %c0_49 = arith.constant 0 : index
    %c0_50 = arith.constant 0 : index
    %c0_51 = arith.constant 0 : index
    %146 = vector.load %arg8[%c0_49, %c0_50, %c0_51] : memref<1x1x128xf32, #tpu.memory_space<vmem>>, vector<1x1x128xf32>
    %147 = vector.shape_cast %146 : vector<1x1x128xf32> to vector<1x128xf32>
    %148 = vector.broadcast %147 : vector<1x128xf32> to vector<16x128xf32>
    %149 = arith.mulf %148, %145 : vector<16x128xf32>
    %150 = arith.addf %4, %149 : vector<16x128xf32>
    %c0_52 = arith.constant 0 : index
    %c0_53 = arith.constant 0 : index
    %c0_54 = arith.constant 0 : index
    %151 = vector.load %arg9[%c0_52, %c0_53, %c0_54] : memref<1x1x128xf32, #tpu.memory_space<vmem>>, vector<1x1x128xf32>
    %152 = vector.shape_cast %151 : vector<1x1x128xf32> to vector<1x128xf32>
    %c0_55 = arith.constant 0 : index
    %c0_56 = arith.constant 0 : index
    %c0_57 = arith.constant 0 : index
    %153 = vector.load %arg10[%c0_55, %c0_56, %c0_57] : memref<1x1x128xf32, #tpu.memory_space<vmem>>, vector<1x1x128xf32>
    %154 = vector.shape_cast %153 : vector<1x1x128xf32> to vector<1x128xf32>
    %cst_58 = arith.constant dense<0.000000e+00> : vector<16xf32>
    %155 = vector.multi_reduction <add>, %150, %cst_58 [1] : vector<16x128xf32> to vector<16xf32>
    %156 = vector.shape_cast %155 : vector<16xf32> to vector<16x1xf32>
    %cst_59 = arith.constant 1.280000e+02 : f32
    %157 = vector.broadcast %cst_59 : f32 to vector<16x1xf32>
    %158 = arith.divf %156, %157 : vector<16x1xf32>
    %159 = vector.broadcast %158 : vector<16x1xf32> to vector<16x128xf32>
    %160 = arith.subf %150, %159 : vector<16x128xf32>
    %161 = arith.mulf %160, %160 : vector<16x128xf32>
    %cst_60 = arith.constant dense<0.000000e+00> : vector<16xf32>
    %162 = vector.multi_reduction <add>, %161, %cst_60 [1] : vector<16x128xf32> to vector<16xf32>
    %163 = vector.shape_cast %162 : vector<16xf32> to vector<16x1xf32>
    %cst_61 = arith.constant 1.280000e+02 : f32
    %164 = vector.broadcast %cst_61 : f32 to vector<16x1xf32>
    %165 = arith.divf %163, %164 : vector<16x1xf32>
    %cst_62 = arith.constant 9.99999997E-7 : f32
    %166 = vector.broadcast %cst_62 : f32 to vector<16x1xf32>
    %167 = arith.addf %165, %166 : vector<16x1xf32>
    %168 = math.rsqrt %167 : vector<16x1xf32>
    %169 = vector.broadcast %168 : vector<16x1xf32> to vector<16x128xf32>
    %170 = arith.mulf %160, %169 : vector<16x128xf32>
    %171 = vector.broadcast %152 : vector<1x128xf32> to vector<16x128xf32>
    %172 = arith.mulf %170, %171 : vector<16x128xf32>
    %173 = vector.broadcast %154 : vector<1x128xf32> to vector<16x128xf32>
    %174 = arith.addf %172, %173 : vector<16x128xf32>
    %175 = arith.truncf %174 : vector<16x128xf32> to vector<16x128xbf16>
    %c0_63 = arith.constant 0 : index
    %c0_64 = arith.constant 0 : index
    %c0_65 = arith.constant 0 : index
    %176 = vector.load %arg11[%c0_63, %c0_64, %c0_65] : memref<1x128x512xbf16, #tpu.memory_space<vmem>>, vector<1x128x512xbf16>
    %177 = vector.shape_cast %176 : vector<1x128x512xbf16> to vector<128x512xbf16>
    %cst_66 = arith.constant dense<0.000000e+00> : vector<16x512xf32>
    %178 = tpu.matmul %175, %177, %cst_66 {dimension_numbers = #tpu.dot_dimension_numbers<[1], [0], [0], [1], [0, 0, 1, 1], [], []>} : vector<16x128xbf16>, vector<128x512xbf16>, vector<16x512xf32> -> vector<16x512xf32>
    %c0_67 = arith.constant 0 : index
    %c0_68 = arith.constant 0 : index
    %c0_69 = arith.constant 0 : index
    %179 = vector.load %arg12[%c0_67, %c0_68, %c0_69] : memref<1x1x512xf32, #tpu.memory_space<vmem>>, vector<1x1x512xf32>
    %180 = vector.shape_cast %179 : vector<1x1x512xf32> to vector<1x512xf32>
    %181 = vector.broadcast %180 : vector<1x512xf32> to vector<16x512xf32>
    %182 = arith.addf %178, %181 : vector<16x512xf32>
    %cst_70 = arith.constant 5.000000e-01 : f32
    %183 = vector.broadcast %cst_70 : f32 to vector<16x512xf32>
    %184 = arith.mulf %183, %182 : vector<16x512xf32>
    %cst_71 = arith.constant 0.707106769 : f32
    %185 = vector.broadcast %cst_71 : f32 to vector<16x512xf32>
    %186 = arith.mulf %182, %185 : vector<16x512xf32>
    %187 = math.absf %186 : vector<16x512xf32>
    %cst_72 = arith.constant 0.327591091 : f32
    %188 = vector.broadcast %cst_72 : f32 to vector<16x512xf32>
    %189 = arith.mulf %188, %187 : vector<16x512xf32>
    %cst_73 = arith.constant 1.000000e+00 : f32
    %190 = vector.broadcast %cst_73 : f32 to vector<16x512xf32>
    %191 = arith.addf %190, %189 : vector<16x512xf32>
    %cst_74 = arith.constant 1.000000e+00 : f32
    %192 = vector.broadcast %cst_74 : f32 to vector<16x512xf32>
    %193 = arith.divf %192, %191 : vector<16x512xf32>
    %cst_75 = arith.constant 1.06140542 : f32
    %194 = vector.broadcast %cst_75 : f32 to vector<16x512xf32>
    %195 = arith.mulf %194, %193 : vector<16x512xf32>
    %cst_76 = arith.constant -1.45315206 : f32
    %196 = vector.broadcast %cst_76 : f32 to vector<16x512xf32>
    %197 = arith.addf %195, %196 : vector<16x512xf32>
    %198 = arith.mulf %197, %193 : vector<16x512xf32>
    %cst_77 = arith.constant 1.42141378 : f32
    %199 = vector.broadcast %cst_77 : f32 to vector<16x512xf32>
    %200 = arith.addf %198, %199 : vector<16x512xf32>
    %201 = arith.mulf %200, %193 : vector<16x512xf32>
    %cst_78 = arith.constant -0.284496725 : f32
    %202 = vector.broadcast %cst_78 : f32 to vector<16x512xf32>
    %203 = arith.addf %201, %202 : vector<16x512xf32>
    %204 = arith.mulf %203, %193 : vector<16x512xf32>
    %cst_79 = arith.constant 0.254829586 : f32
    %205 = vector.broadcast %cst_79 : f32 to vector<16x512xf32>
    %206 = arith.addf %204, %205 : vector<16x512xf32>
    %207 = arith.mulf %206, %193 : vector<16x512xf32>
    %cst_80 = arith.constant 0.000000e+00 : f32
    %208 = vector.broadcast %cst_80 : f32 to vector<16x512xf32>
    %209 = arith.subf %208, %187 : vector<16x512xf32>
    %210 = arith.mulf %209, %187 : vector<16x512xf32>
    %211 = math.exp %210 : vector<16x512xf32>
    %212 = arith.mulf %207, %211 : vector<16x512xf32>
    %cst_81 = arith.constant 1.000000e+00 : f32
    %213 = vector.broadcast %cst_81 : f32 to vector<16x512xf32>
    %214 = arith.subf %213, %212 : vector<16x512xf32>
    %cst_82 = arith.constant 0.000000e+00 : f32
    %215 = vector.broadcast %cst_82 : f32 to vector<16x512xf32>
    %216 = arith.cmpf oge, %186, %215 : vector<16x512xf32>
    %cst_83 = arith.constant 0.000000e+00 : f32
    %217 = vector.broadcast %cst_83 : f32 to vector<16x512xf32>
    %218 = arith.subf %217, %214 : vector<16x512xf32>
    %219 = arith.select %216, %214, %218 : vector<16x512xi1>, vector<16x512xf32>
    %cst_84 = arith.constant 1.000000e+00 : f32
    %220 = vector.broadcast %cst_84 : f32 to vector<16x512xf32>
    %221 = arith.addf %220, %219 : vector<16x512xf32>
    %222 = arith.mulf %184, %221 : vector<16x512xf32>
    %223 = arith.truncf %222 : vector<16x512xf32> to vector<16x512xbf16>
    %c0_85 = arith.constant 0 : index
    %c0_86 = arith.constant 0 : index
    %c0_87 = arith.constant 0 : index
    %224 = vector.load %arg13[%c0_85, %c0_86, %c0_87] : memref<1x512x128xbf16, #tpu.memory_space<vmem>>, vector<1x512x128xbf16>
    %225 = vector.shape_cast %224 : vector<1x512x128xbf16> to vector<512x128xbf16>
    %cst_88 = arith.constant dense<0.000000e+00> : vector<16x128xf32>
    %226 = tpu.matmul %223, %225, %cst_88 {dimension_numbers = #tpu.dot_dimension_numbers<[1], [0], [0], [1], [0, 0, 1, 1], [], []>} : vector<16x512xbf16>, vector<512x128xbf16>, vector<16x128xf32> -> vector<16x128xf32>
    %c0_89 = arith.constant 0 : index
    %c0_90 = arith.constant 0 : index
    %c0_91 = arith.constant 0 : index
    %227 = vector.load %arg14[%c0_89, %c0_90, %c0_91] : memref<1x1x128xf32, #tpu.memory_space<vmem>>, vector<1x1x128xf32>
    %228 = vector.shape_cast %227 : vector<1x1x128xf32> to vector<1x128xf32>
    %229 = vector.broadcast %228 : vector<1x128xf32> to vector<16x128xf32>
    %230 = arith.addf %226, %229 : vector<16x128xf32>
    %c0_92 = arith.constant 0 : index
    %c0_93 = arith.constant 0 : index
    %c0_94 = arith.constant 0 : index
    %231 = vector.load %arg15[%c0_92, %c0_93, %c0_94] : memref<1x1x128xf32, #tpu.memory_space<vmem>>, vector<1x1x128xf32>
    %232 = vector.shape_cast %231 : vector<1x1x128xf32> to vector<1x128xf32>
    %233 = vector.broadcast %232 : vector<1x128xf32> to vector<16x128xf32>
    %234 = arith.mulf %233, %230 : vector<16x128xf32>
    %235 = arith.addf %150, %234 : vector<16x128xf32>
    %236 = vector.shape_cast %235 : vector<16x128xf32> to vector<2x8x128xf32>
    %c0_95 = arith.constant 0 : index
    %c0_96 = arith.constant 0 : index
    %c0_97 = arith.constant 0 : index
    %237 = vector.load %arg16[%c0_95, %c0_96, %c0_97] : memref<2x8x128xf32, #tpu.memory_space<vmem>>, vector<2x8x128xf32>
    tpu.vector_store %arg16[%c0_95, %c0_96, %c0_97], %236 {strides = array<i32>} : memref<2x8x128xf32, #tpu.memory_space<vmem>>, vector<2x8x128xf32>,
    return
  }
  func.func @transform_0(%arg0: i32) -> (i32, i32, i32) {
    %c0_i32 = arith.constant 0 : i32
    %c0_i32_0 = arith.constant 0 : i32
    %c0_i32_1 = arith.constant 0 : i32
    %c0_i32_2 = arith.constant 0 : i32
    return %c0_i32, %c0_i32_0, %c0_i32_1 : i32, i32, i32
  }
  func.func @transform_1(%arg0: i32) -> (i32, i32, i32) {
    %c0_i32 = arith.constant 0 : i32
    %c0_i32_0 = arith.constant 0 : i32
    %c0_i32_1 = arith.constant 0 : i32
    return %arg0, %c0_i32, %c0_i32_0 : i32, i32, i32
  }
  func.func @transform_2(%arg0: i32) -> (i32, i32, i32) {
    %c0_i32 = arith.constant 0 : i32
    %c0_i32_0 = arith.constant 0 : i32
    %c0_i32_1 = arith.constant 0 : i32
    return %arg0, %c0_i32, %c0_i32_0 : i32, i32, i32
  }
  func.func @transform_3(%arg0: i32) -> (i32, i32, i32) {
    %c0_i32 = arith.constant 0 : i32
    %c0_i32_0 = arith.constant 0 : i32
    %c0_i32_1 = arith.constant 0 : i32
    return %arg0, %c0_i32, %c0_i32_0 : i32, i32, i32
  }
  func.func @transform_4(%arg0: i32) -> (i32, i32, i32) {
    %c0_i32 = arith.constant 0 : i32
    %c0_i32_0 = arith.constant 0 : i32
    %c0_i32_1 = arith.constant 0 : i32
    return %arg0, %c0_i32, %c0_i32_0 : i32, i32, i32
  }
  func.func @transform_5(%arg0: i32) -> (i32, i32, i32) {
    %c0_i32 = arith.constant 0 : i32
    %c0_i32_0 = arith.constant 0 : i32
    %c0_i32_1 = arith.constant 0 : i32
    return %arg0, %c0_i32, %c0_i32_0 : i32, i32, i32
  }
  func.func @transform_6(%arg0: i32) -> (i32, i32, i32) {
    %c0_i32 = arith.constant 0 : i32
    %c0_i32_0 = arith.constant 0 : i32
    %c0_i32_1 = arith.constant 0 : i32
    return %arg0, %c0_i32, %c0_i32_0 : i32, i32, i32
  }
  func.func @transform_7(%arg0: i32) -> (i32, i32, i32) {
    %c0_i32 = arith.constant 0 : i32
    %c0_i32_0 = arith.constant 0 : i32
    %c0_i32_1 = arith.constant 0 : i32
    return %arg0, %c0_i32, %c0_i32_0 : i32, i32, i32
  }
  func.func @transform_8(%arg0: i32) -> (i32, i32, i32) {
    %c0_i32 = arith.constant 0 : i32
    %c0_i32_0 = arith.constant 0 : i32
    %c0_i32_1 = arith.constant 0 : i32
    return %arg0, %c0_i32, %c0_i32_0 : i32, i32, i32
  }
  func.func @transform_9(%arg0: i32) -> (i32, i32, i32) {
    %c0_i32 = arith.constant 0 : i32
    %c0_i32_0 = arith.constant 0 : i32
    %c0_i32_1 = arith.constant 0 : i32
    return %arg0, %c0_i32, %c0_i32_0 : i32, i32, i32
  }
  func.func @transform_10(%arg0: i32) -> (i32, i32, i32) {
    %c0_i32 = arith.constant 0 : i32
    %c0_i32_0 = arith.constant 0 : i32
    %c0_i32_1 = arith.constant 0 : i32
    return %arg0, %c0_i32, %c0_i32_0 : i32, i32, i32
  }
  func.func @transform_11(%arg0: i32) -> (i32, i32, i32) {
    %c0_i32 = arith.constant 0 : i32
    %c0_i32_0 = arith.constant 0 : i32
    %c0_i32_1 = arith.constant 0 : i32
    return %arg0, %c0_i32, %c0_i32_0 : i32, i32, i32
  }
  func.func @transform_12(%arg0: i32) -> (i32, i32, i32) {
    %c0_i32 = arith.constant 0 : i32
    %c0_i32_0 = arith.constant 0 : i32
    %c0_i32_1 = arith.constant 0 : i32
    return %arg0, %c0_i32, %c0_i32_0 : i32, i32, i32
  }
  func.func @transform_13(%arg0: i32) -> (i32, i32, i32) {
    %c0_i32 = arith.constant 0 : i32
    %c0_i32_0 = arith.constant 0 : i32
    %c0_i32_1 = arith.constant 0 : i32
    return %arg0, %c0_i32, %c0_i32_0 : i32, i32, i32
  }
  func.func @transform_14(%arg0: i32) -> (i32, i32, i32) {
    %c0_i32 = arith.constant 0 : i32
    %c0_i32_0 = arith.constant 0 : i32
    %c0_i32_1 = arith.constant 0 : i32
    return %arg0, %c0_i32, %c0_i32_0 : i32, i32, i32
  }
  func.func @transform_15(%arg0: i32) -> (i32, i32, i32) {
    %c0_i32 = arith.constant 0 : i32
    %c0_i32_0 = arith.constant 0 : i32
    %c0_i32_1 = arith.constant 0 : i32
    %c0_i32_2 = arith.constant 0 : i32
    return %c0_i32, %c0_i32_0, %c0_i32_1 : i32, i32, i32
  }
}

module attributes {stable_mosaic.version = 11 : i64} {
  func.func @_norm_head_kernel(%arg0: i32, %arg1: memref<2x128xf32, #tpu.memory_space<vmem>>, %arg2: memref<1x128xf32, #tpu.memory_space<vmem>>, %arg3: memref<1x128xf32, #tpu.memory_space<vmem>>, %arg4: memref<128x128xbf16, #tpu.memory_space<vmem>>, %arg5: memref<1x128xf32, #tpu.memory_space<vmem>>, %arg6: memref<2x128xf32, #tpu.memory_space<vmem>>) attributes {dimension_semantics = [#tpu.dimension_semantics<arbitrary>], iteration_bounds = array<i64: 1>, scalar_prefetch = 0 : i64, scratch_operands = 0 : i64, tpu.core_type = #tpu.core_type<tc>, window_params = [{pipeline_mode = #tpu.pipeline_mode<synchronous>, transform_indices = @transform_0, window_bounds = array<i64: 2, 128>}, {pipeline_mode = #tpu.pipeline_mode<synchronous>, transform_indices = @transform_1, window_bounds = array<i64: 1, 128>}, {pipeline_mode = #tpu.pipeline_mode<synchronous>, transform_indices = @transform_2, window_bounds = array<i64: 1, 128>}, {pipeline_mode = #tpu.pipeline_mode<synchronous>, transform_indices = @transform_3, window_bounds = array<i64: 128, 128>}, {pipeline_mode = #tpu.pipeline_mode<synchronous>, transform_indices = @transform_4, window_bounds = array<i64: 1, 128>}, {pipeline_mode = #tpu.pipeline_mode<synchronous>, transform_indices = @transform_5, window_bounds = array<i64: 2, 128>}]} {
    %c0 = arith.constant 0 : index
    %c0_0 = arith.constant 0 : index
    %0 = vector.load %arg1[%c0, %c0_0] : memref<2x128xf32, #tpu.memory_space<vmem>>, vector<2x128xf32>
    %c0_1 = arith.constant 0 : index
    %c0_2 = arith.constant 0 : index
    %1 = vector.load %arg2[%c0_1, %c0_2] : memref<1x128xf32, #tpu.memory_space<vmem>>, vector<1x128xf32>
    %c0_3 = arith.constant 0 : index
    %c0_4 = arith.constant 0 : index
    %2 = vector.load %arg3[%c0_3, %c0_4] : memref<1x128xf32, #tpu.memory_space<vmem>>, vector<1x128xf32>
    %cst = arith.constant dense<0.000000e+00> : vector<2xf32>
    %3 = vector.multi_reduction <add>, %0, %cst [1] : vector<2x128xf32> to vector<2xf32>
    %4 = vector.shape_cast %3 : vector<2xf32> to vector<2x1xf32>
    %cst_5 = arith.constant 1.280000e+02 : f32
    %5 = vector.broadcast %cst_5 : f32 to vector<2x1xf32>
    %6 = arith.divf %4, %5 : vector<2x1xf32>
    %7 = vector.broadcast %6 : vector<2x1xf32> to vector<2x128xf32>
    %8 = arith.subf %0, %7 : vector<2x128xf32>
    %9 = arith.mulf %8, %8 : vector<2x128xf32>
    %cst_6 = arith.constant dense<0.000000e+00> : vector<2xf32>
    %10 = vector.multi_reduction <add>, %9, %cst_6 [1] : vector<2x128xf32> to vector<2xf32>
    %11 = vector.shape_cast %10 : vector<2xf32> to vector<2x1xf32>
    %cst_7 = arith.constant 1.280000e+02 : f32
    %12 = vector.broadcast %cst_7 : f32 to vector<2x1xf32>
    %13 = arith.divf %11, %12 : vector<2x1xf32>
    %cst_8 = arith.constant 9.99999997E-7 : f32
    %14 = vector.broadcast %cst_8 : f32 to vector<2x1xf32>
    %15 = arith.addf %13, %14 : vector<2x1xf32>
    %16 = math.rsqrt %15 : vector<2x1xf32>
    %17 = vector.broadcast %16 : vector<2x1xf32> to vector<2x128xf32>
    %18 = arith.mulf %8, %17 : vector<2x128xf32>
    %19 = vector.broadcast %1 : vector<1x128xf32> to vector<2x128xf32>
    %20 = arith.mulf %18, %19 : vector<2x128xf32>
    %21 = vector.broadcast %2 : vector<1x128xf32> to vector<2x128xf32>
    %22 = arith.addf %20, %21 : vector<2x128xf32>
    %23 = arith.truncf %22 : vector<2x128xf32> to vector<2x128xbf16>
    %c0_9 = arith.constant 0 : index
    %c0_10 = arith.constant 0 : index
    %24 = vector.load %arg4[%c0_9, %c0_10] : memref<128x128xbf16, #tpu.memory_space<vmem>>, vector<128x128xbf16>
    %cst_11 = arith.constant dense<0.000000e+00> : vector<2x128xf32>
    %25 = tpu.matmul %23, %24, %cst_11 {dimension_numbers = #tpu.dot_dimension_numbers<[1], [0], [0], [1], [0, 0, 1, 1], [], []>} : vector<2x128xbf16>, vector<128x128xbf16>, vector<2x128xf32> -> vector<2x128xf32>
    %c0_12 = arith.constant 0 : index
    %c0_13 = arith.constant 0 : index
    %26 = vector.load %arg5[%c0_12, %c0_13] : memref<1x128xf32, #tpu.memory_space<vmem>>, vector<1x128xf32>
    %27 = vector.broadcast %26 : vector<1x128xf32> to vector<2x128xf32>
    %28 = arith.addf %25, %27 : vector<2x128xf32>
    %c0_14 = arith.constant 0 : index
    %c0_15 = arith.constant 0 : index
    %29 = vector.load %arg6[%c0_14, %c0_15] : memref<2x128xf32, #tpu.memory_space<vmem>>, vector<2x128xf32>
    tpu.vector_store %arg6[%c0_14, %c0_15], %28 {strides = array<i32>} : memref<2x128xf32, #tpu.memory_space<vmem>>, vector<2x128xf32>,
    return
  }
  func.func @transform_0(%arg0: i32) -> (i32, i32) {
    %c0_i32 = arith.constant 0 : i32
    %c0_i32_0 = arith.constant 0 : i32
    %c0_i32_1 = arith.constant 0 : i32
    return %c0_i32, %c0_i32_0 : i32, i32
  }
  func.func @transform_1(%arg0: i32) -> (i32, i32) {
    %c0_i32 = arith.constant 0 : i32
    %c0_i32_0 = arith.constant 0 : i32
    %c0_i32_1 = arith.constant 0 : i32
    return %c0_i32, %c0_i32_0 : i32, i32
  }
  func.func @transform_2(%arg0: i32) -> (i32, i32) {
    %c0_i32 = arith.constant 0 : i32
    %c0_i32_0 = arith.constant 0 : i32
    %c0_i32_1 = arith.constant 0 : i32
    return %c0_i32, %c0_i32_0 : i32, i32
  }
  func.func @transform_3(%arg0: i32) -> (i32, i32) {
    %c0_i32 = arith.constant 0 : i32
    %c0_i32_0 = arith.constant 0 : i32
    %c0_i32_1 = arith.constant 0 : i32
    return %c0_i32, %c0_i32_0 : i32, i32
  }
  func.func @transform_4(%arg0: i32) -> (i32, i32) {
    %c0_i32 = arith.constant 0 : i32
    %c0_i32_0 = arith.constant 0 : i32
    %c0_i32_1 = arith.constant 0 : i32
    return %c0_i32, %c0_i32_0 : i32, i32
  }
  func.func @transform_5(%arg0: i32) -> (i32, i32) {
    %c0_i32 = arith.constant 0 : i32
    %c0_i32_0 = arith.constant 0 : i32
    %c0_i32_1 = arith.constant 0 : i32
    return %c0_i32, %c0_i32_0 : i32, i32
  }
}

</mosaic_0001>

<bundles_post_ra>
// kernel: vit_forward.5
= control target key start
LH: loop header
LB: loop body
LE: loop exit
PB: predicated region body
PF: predicated region fallthrough
CT: control target
= control target key end

     0   :  { %vm25_vm0 = vcmask 1041408   ;;  %s330_s0 = inlined_call_operand.vmem [shape: f32[2,128], index: 0, kind: input, shape index: {}]   ;;  %s331_s1 = inlined_call_operand.vmem [shape: f32[1,128], index: 1, kind: input, shape index: {}]   ;;  %s332_s2 = inlined_call_operand.vmem [shape: f32[1,128], index: 2, kind: input, shape index: {}]   ;;  %s333_s3 = inlined_call_operand.vmem [shape: bf16[128,128], index: 3, kind: input, shape index: {}]   ;;  %s334_s4 = inlined_call_operand.vmem [shape: f32[1,128], index: 4, kind: input, shape index: {}]   ;;  %s335_s5 = inlined_call_operand.hbm [shape: f32[2,128], index: 5, kind: output, shape index: {}]  }
   0x1   :  { %v22_v0 = vld [vmem:[%s330_s0] sm:$0x3] }
   0x2   :  { %v26_v1 = vsel %vm25_vm0, %v22_v0, 0.0 }
   0x3   :  { %27 = vadd.xlane.f32.xlu0 %v26_v1 }
   0x4   :  { %10 = vsyncpa [#allocation3], 0  ;;  %v224_v2 = vld [vmem:[%s333_s3 + $0x38] sm:$0xff]   ;;  %v256_v3 = vmov 0.0   ;;  %v225_v4 = vld [vmem:[%s333_s3 + $0x30] sm:$0xff]   ;;  %vm257_vm1 = vmmov 0  }
   0x5   :  { %201 = vmatprep.subr.bf16.mxu0 %v256_v3  ;;  %v226_v10 = vld [vmem:[%s333_s3 + $0x28] sm:$0xff]   ;;  %v227_v11 = vld [vmem:[%s333_s3 + $0x20] sm:$0xff]   ;;  %217 = vmatprep.mubr.msk.bf16.mxu0 %vm257_vm1, %v256_v3  ;;  %v228_v12 = vld [vmem:[%s333_s3 + $0x18] sm:$0xff]   ;;  %s258_s15 = smov [#allocation2]  }
   0x6   :  { %202 = vmatpush3.bf16.msra.mxu0 %v224_v2  ;;  %v229_v13 = vld [vmem:[%s333_s3 + $0x10] sm:$0xff]   ;;  %v230_v14 = vld [vmem:[%s333_s3 + $0x8] sm:$0xff]   ;;  %v231_v15 = vld [vmem:[%s333_s3] sm:$0xff]   ;;  %s173_s16 = sshll.u32 %s258_s15, 4  ;;  %s174_s16 = int_to_ptr.vmem [resolvable:$true] %s173_s16 }
   0x7   :  { %203 = vmatprep.subr.bf16.mxu0 %v256_v3  ;;  %v181_v20 = vld [vmem:[%s331_s1] ss:$0 sm:$0xff]  ;;  %s234_s1 = scalar_lea.vmem %s174_s16, 32  ;;  %p239_p1 = scmp.lt.s32.totalorder %s174_s16, %s174_s16 }
   0x8   :  { %v182_v22 = vld [vmem:[%s332_s2] ss:$0 sm:$0xff]  ;;  %p235_p0 = scmp.ne.s32.totalorder %s174_s16, %s234_s1  ;;  %p240_p2 = scmp.lt.s32.totalorder %s234_s1, %s234_s1 }
   0x9   :  { %v183_v26 = vld [vmem:[%s334_s4] ss:$0 sm:$0xff] }
   0xa   :  { %204 = vmatpush3.bf16.msra.mxu0 %v225_v4  ;;  %p241_p3 = por %p240_p2, %p239_p1 }
   0xb   :  { %205 = vmatprep.subr.bf16.mxu0 %v256_v3 }
   0xc   :  { %p242_p4 = pnand %p241_p3, %p235_p0 }
   0xe   :  { %206 = vmatpush3.bf16.msra.mxu0 %v226_v10 }
   0xf   :  { %207 = vmatprep.subr.bf16.mxu0 %v256_v3 }
  0x12   :  { %208 = vmatpush3.bf16.msra.mxu0 %v227_v11 }
  0x13   :  { %209 = vmatprep.subr.bf16.mxu0 %v256_v3 }
  0x16   :  { %210 = vmatpush3.bf16.msra.mxu0 %v228_v12 }
  0x17   :  { %211 = vmatprep.subr.bf16.mxu0 %v256_v3 }
  0x1a   :  { %212 = vmatpush3.bf16.msra.mxu0 %v229_v13 }
  0x1b   :  { %213 = vmatprep.subr.bf16.mxu0 %v256_v3 }
  0x1e   :  { %214 = vmatpush3.bf16.msra.mxu0 %v230_v14 }
  0x1f   :  { %215 = vmatprep.subr.bf16.mxu0 %v256_v3 }
  0x22   :  { %216 = vmatpush3.bf16.msra.mxu0 %v231_v15 }
  0x8c   :  { %v28_v5 = vpop.xlane.xlu0 %27 }
  0x8d   :  { %v30_v6 = vmul.f32 0.0078125, %v28_v5 }
  0x8f   :  { %v31_v7 = vsub.f32 %v22_v0, %v30_v6 }
  0x91   :  { %v32_v8 = vmul.f32 %v31_v7, %v31_v7 }
  0x93   :  { %v33_v9 = vsel %vm25_vm0, %v32_v8, 0.0 }
  0x94   :  { %34 = vadd.xlane.f32.xlu0 %v33_v9 }
 0x11d   :  { %v35_v16 = vpop.xlane.xlu0 %34 }
 0x11e   :  { %v36_v17 = vmul.f32 0.0078125, %v35_v16 }
 0x120   :  { %v37_v18 = vadd.f32 1e-06, %v36_v17 }
 0x122   :  { %232 = vrsqrt.f32 %v37_v18 }
 0x12f   :  { %v233_v19 = vpop.eup %232 }
 0x130   :  { %v39_v21 = vmul.f32 %v233_v19, %v31_v7 }
 0x132   :  { %v46_v23 = vmul.f32 %v181_v20, %v39_v21 }
 0x134   :  { %v53_v24 = vadd.f32 %v182_v22, %v46_v23 }
 0x136   :  { %v54_v25 = vpack.c.bf16 %v53_v24, %v53_v24 }
 0x138   :  { %218 = vmatmul.mubr.bf16.vlgmr.msra.gmra.mxu0 %v54_v25 }
 0x1f8   :  { %v160_v27 = vpop.f32.mrf.mxu0 }
 0x1f9   :  { %v161_v28 = vadd.f32 %v183_v26, %v160_v27 }
 0x1fa   :  { %v219_v29 = vpop.f32.mrf.mxu0 }
 0x1fb   :  { %166 = vst [vmem:[#allocation2] sm:$0x3] %v161_v28 }
 0x1fc   :  { %v163_v30 = vpop.f32.mrf.mxu0 }
 0x1fd   :  { %245 = shalt.err (!%p242_p4)
}
 0x1fe   :  { %176 = dma.vmem_to_hbm [thread:$0]  %s174_s16, 32, %s335_s5, [#allocation3]   ;;  %v220_v31 = vpop.f32.mrf.mxu0 }
 0x1ff   :  { %254 = dma.done.wait [#allocation3], 32  }
 0x200   :  { %255 = vsyncadd [#allocation3], 4294967264 }
 0x201   :  { %180 = vsyncpa [#allocation3], 1 }

// kernel: vit_forward.3
= control target key start
LH: loop header
LB: loop body
LE: loop exit
PB: predicated region body
PF: predicated region fallthrough
CT: control target
= control target key end

     0   :  { %v663_v35 = vmov 0.0   ;;  %vm664_vm0 = vmmov 0   ;;  %vm484_vm1 = vcmask 1040384   ;;  %vm486_vm2 = vcmask 1044480   ;;  %s851_s1 = inlined_call_operand.vmem [shape: bf16[640,128], index: 1, kind: input, shape index: {}]   ;;  %s852_s0 = inlined_call_operand.vmem [shape: f32[8,640], index: 0, kind: input, shape index: {}]   ;;  %s853_s2 = inlined_call_operand.vmem [shape: f32[1,128], index: 2, kind: input, shape index: {}]   ;;  %s854_s4 = inlined_call_operand.vmem [shape: f32[4,128], index: 4, kind: input, shape index: {}]   ;;  %s855_s3 = inlined_call_operand.vmem [shape: f32[1,128], index: 3, kind: input, shape index: {}]   ;;  %s856_s5 = inlined_call_operand.vmem [shape: f32[2,8,128], index: 5, kind: output, shape index: {}]  }
   0x1   :  { %v623_v0 = vld [vmem:[%s851_s1 + $0x78] sm:$0xff]   ;;  %v627_v4 = vld [vmem:[%s851_s1 + $0x70] sm:$0xff]   ;;  %v631_v8 = vld [vmem:[%s851_s1 + $0x68] sm:$0xff]  }
   0x2   :  { %v624_v1 = vld [vmem:[%s851_s1 + $0x38] sm:$0xff]   ;;  %548 = vmatprep.subr.bf16.mxu0 %v623_v0  ;;  %v628_v5 = vld [vmem:[%s851_s1 + $0x30] sm:$0xff]   ;;  %v632_v9 = vld [vmem:[%s851_s1 + $0x28] sm:$0xff]  }
   0x3   :  { %v625_v2 = vld [vmem:[%s851_s1 + $0xf8] sm:$0xff]   ;;  %549 = vmatpush3.bf16.msra.mxu0 %v624_v1  ;;  %v629_v6 = vld [vmem:[%s851_s1 + $0xf0] sm:$0xff]   ;;  %v633_v10 = vld [vmem:[%s851_s1 + $0xe8] sm:$0xff]  }
   0x4   :  { %v626_v3 = vld [vmem:[%s851_s1 + $0xb8] sm:$0xff]   ;;  %570 = vmatprep.subr.bf16.mxu1 %v625_v2  ;;  %550 = vmatprep.subr.bf16.mxu0 %v627_v4  ;;  %v630_v7 = vld [vmem:[%s851_s1 + $0xb0] sm:$0xff]   ;;  %v634_v11 = vld [vmem:[%s851_s1 + $0xa8] sm:$0xff]  }
   0x5   :  { %571 = vmatpush3.bf16.msra.mxu1 %v626_v3  ;;  %v635_v12 = vld [vmem:[%s851_s1 + $0x60] sm:$0xff]   ;;  %v639_v16 = vld [vmem:[%s851_s1 + $0x58] sm:$0xff]   ;;  %v643_v20 = vld [vmem:[%s851_s1 + $0x50] sm:$0xff]  }
   0x6   :  { %572 = vmatprep.subr.bf16.mxu1 %v629_v6  ;;  %v636_v13 = vld [vmem:[%s851_s1 + $0x20] sm:$0xff]   ;;  %v640_v17 = vld [vmem:[%s851_s1 + $0x18] sm:$0xff]   ;;  %v644_v21 = vld [vmem:[%s851_s1 + $0x10] sm:$0xff]  }
   0x7   :  { %551 = vmatpush3.bf16.msra.mxu0 %v628_v5  ;;  %v637_v14 = vld [vmem:[%s851_s1 + $0xe0] sm:$0xff]   ;;  %v641_v18 = vld [vmem:[%s851_s1 + $0xd8] sm:$0xff]   ;;  %v645_v22 = vld [vmem:[%s851_s1 + $0xd0] sm:$0xff]  }
   0x8   :  { %552 = vmatprep.subr.bf16.mxu0 %v631_v8  ;;  %v638_v15 = vld [vmem:[%s851_s1 + $0xa0] sm:$0xff]   ;;  %v642_v19 = vld [vmem:[%s851_s1 + $0x98] sm:$0xff]   ;;  %v646_v23 = vld [vmem:[%s851_s1 + $0x90] sm:$0xff]  }
   0x9   :  { %573 = vmatpush3.bf16.msra.mxu1 %v630_v7  ;;  %v647_v24 = vld [vmem:[%s851_s1 + $0x48] sm:$0xff]   ;;  %v651_v28 = vld [vmem:[%s851_s1 + $0x40] sm:$0xff]   ;;  %v24_v36 = vld [vmem:[%s852_s0 + $0x18] sm:$0xff] }
   0xa   :  { %574 = vmatprep.subr.bf16.mxu1 %v633_v10  ;;  %v648_v25 = vld [vmem:[%s851_s1 + $0x8] sm:$0xff]   ;;  %v652_v29 = vld [vmem:[%s851_s1] sm:$0xff]   ;;  %v29_v38 = vpack.c.bf16 %v24_v36, %v24_v36  ;;  %v655_v39 = vld [vmem:[%s851_s1 + $0x138] sm:$0xff]  }
   0xb   :  { %553 = vmatpush3.bf16.msra.mxu0 %v632_v9  ;;  %v649_v26 = vld [vmem:[%s851_s1 + $0xc8] sm:$0xff]   ;;  %v653_v30 = vld [vmem:[%s851_s1 + $0xc0] sm:$0xff]   ;;  %v23_v40 = vld [vmem:[%s852_s0 + $0x10] sm:$0xff] }
   0xc   :  { %554 = vmatprep.subr.bf16.mxu0 %v635_v12  ;;  %v650_v27 = vld [vmem:[%s851_s1 + $0x88] sm:$0xff]   ;;  %v654_v33 = vld [vmem:[%s851_s1 + $0x80] sm:$0xff]   ;;  %430 = vmatprep.mubr.bf16.mxu1 %v29_v38  ;;  %v28_v41 = vpack.c.bf16 %v23_v40, %v23_v40  ;;  %v656_v42 = vld [vmem:[%s851_s1 + $0x130] sm:$0xff]  }
   0xd   :  { %575 = vmatpush3.bf16.msra.mxu1 %v634_v11  ;;  %v22_v31 = vld [vmem:[%s852_s0 + $0x8] sm:$0xff]  ;;  %v21_v34 = vld [vmem:[%s852_s0] sm:$0xff]  ;;  %v659_v45 = vld [vmem:[%s851_s1 + $0x118] sm:$0xff]  }
   0xe   :  { %576 = vmatprep.subr.bf16.mxu1 %v637_v14  ;;  %v27_v32 = vpack.c.bf16 %v22_v31, %v22_v31  ;;  %v26_v37 = vpack.c.bf16 %v21_v34, %v21_v34  ;;  %v657_v43 = vld [vmem:[%s851_s1 + $0x128] sm:$0xff]   ;;  %v658_v44 = vld [vmem:[%s851_s1 + $0x120] sm:$0xff]   ;;  %v660_v46 = vld [vmem:[%s851_s1 + $0x110] sm:$0xff]  }
   0xf   :  { %555 = vmatpush3.bf16.msra.mxu0 %v636_v13  ;;  %v661_v47 = vld [vmem:[%s851_s1 + $0x108] sm:$0xff]   ;;  %v662_v48 = vld [vmem:[%s851_s1 + $0x100] sm:$0xff]  }
  0x10   :  { %556 = vmatprep.subr.bf16.mxu0 %v639_v16  ;;  %390 = vmatprep.mubr.bf16.mxu0 %v27_v32  ;;  %v25_v49 = vld [vmem:[%s852_s0 + $0x20] sm:$0xff] }
  0x11   :  { %577 = vmatpush3.bf16.msra.mxu1 %v638_v15  ;;  %v30_v50 = vpack.c.bf16 %v25_v49, %v25_v49  ;;  %v506_v60 = vld [vmem:[%s853_s2] ss:$0 sm:$0xff] }
  0x12   :  { %578 = vmatprep.subr.bf16.mxu1 %v641_v18  ;;  %v490_v63 = vld [vmem:[%s854_s4] sm:$0xf] }
  0x13   :  { %557 = vmatpush3.bf16.msra.mxu0 %v640_v17  ;;  %v492_v1 = vrot.slane %v490_v63, 4  ;;  %v479_v3 = vld [vmem:[%s854_s4] sm:$0xf] }
  0x14   :  { %558 = vmatprep.subr.bf16.mxu0 %v643_v20  ;;  %v478_v8 = vld [vmem:[%s855_s3] sm:$0x1] }
  0x15   :  { %579 = vmatpush3.bf16.msra.mxu1 %v642_v19  ;;  %v489_v9 = vld [vmem:[%s855_s3] sm:$0x1] }
  0x16   :  { %580 = vmatprep.subr.bf16.mxu1 %v645_v22 }
  0x17   :  { %559 = vmatpush3.bf16.msra.mxu0 %v644_v21 }
  0x18   :  { %560 = vmatprep.subr.bf16.mxu0 %v647_v24 }
  0x19   :  { %581 = vmatpush3.bf16.msra.mxu1 %v646_v23 }
  0x1a   :  { %582 = vmatprep.subr.bf16.mxu1 %v649_v26 }
  0x1b   :  { %561 = vmatpush3.bf16.msra.mxu0 %v648_v25 }
  0x1c   :  { %562 = vmatprep.subr.bf16.mxu0 %v651_v28 }
  0x1d   :  { %583 = vmatpush3.bf16.msra.mxu1 %v650_v27 }
  0x1e   :  { %584 = vmatprep.subr.bf16.mxu1 %v653_v30 }
  0x1f   :  { %563 = vmatpush3.bf16.msra.mxu0 %v652_v29 }
  0x20   :  { %601 = vmatprep.subr.bf16.mxu0 %v663_v35 }
  0x21   :  { %585 = vmatpush3.bf16.msra.mxu1 %v654_v33 }
  0x22   :  { %391 = vmatmul.mubr.bf16.vlgmr.msra.gmra.mxu0 %v26_v37 }
  0x23   :  { %602 = vmatpush3.bf16.msra.mxu0 %v655_v39  ;;  %617 = vmatprep.mubr.msk.bf16.mxu0 %vm664_vm0, %v663_v35 }
  0x24   :  { %431 = vmatmul.mubr.bf16.vlgmr.msra.gmra.mxu1 %v28_v41  ;;  %603 = vmatprep.subr.bf16.mxu0 %v663_v35 }
  0x27   :  { %604 = vmatpush3.bf16.msra.mxu0 %v656_v42 }
  0x28   :  { %605 = vmatprep.subr.bf16.mxu0 %v663_v35 }
  0x2b   :  { %606 = vmatpush3.bf16.msra.mxu0 %v657_v43 }
  0x2c   :  { %607 = vmatprep.subr.bf16.mxu0 %v663_v35 }
  0x2f   :  { %608 = vmatpush3.bf16.msra.mxu0 %v658_v44 }
  0x30   :  { %609 = vmatprep.subr.bf16.mxu0 %v663_v35 }
  0x33   :  { %610 = vmatpush3.bf16.msra.mxu0 %v659_v45 }
  0x34   :  { %611 = vmatprep.subr.bf16.mxu0 %v663_v35 }
  0x37   :  { %612 = vmatpush3.bf16.msra.mxu0 %v660_v46 }
  0x38   :  { %613 = vmatprep.subr.bf16.mxu0 %v663_v35 }
  0x3b   :  { %614 = vmatpush3.bf16.msra.mxu0 %v661_v47 }
  0x3c   :  { %615 = vmatprep.subr.bf16.mxu0 %v663_v35 }
  0x3f   :  { %616 = vmatpush3.bf16.msra.mxu0 %v662_v48 }
  0x42   :  { %618 = vmatmul.mubr.bf16.vlgmr.msra.gmra.mxu0 %v30_v50 }
  0xe2   :  { %v564_v51 = vpop.f32.mrf.mxu0 }
  0xe4   :  { %v565_v52 = vpop.f32.mrf.mxu0  ;;  %v586_v53 = vpop.f32.mrf.mxu1 }
  0xe5   :  { %v566_v59 = vadd.f32 %v565_v52, %v564_v51 }
  0xe6   :  { %v567_v54 = vpop.f32.mrf.mxu0  ;;  %v587_v55 = vpop.f32.mrf.mxu1 }
  0xe7   :  { %v393_v61 = vadd.f32 %v566_v59, %v506_v60  ;;  %v588_v62 = vadd.f32 %v587_v55, %v586_v53 }
  0xe8   :  { %v568_v56 = vpop.f32.mrf.mxu0  ;;  %v589_v57 = vpop.f32.mrf.mxu1 }
  0xe9   :  { %v433_v0 = vadd.f32 %v588_v62, %v393_v61 }
  0xea   :  { %v590_v58 = vpop.f32.mrf.mxu1 }
 0x102   :  { %v472_v2 = vpop.f32.mrf.mxu0 }
 0x103   :  { %v473_v4 = vadd.f32 %v472_v2, %v433_v0 }
 0x104   :  { %v619_v5 = vpop.f32.mrf.mxu0 }
 0x105   :  { %v480_v6 = vadd.f32 %v479_v3, %v473_v4  ;;  %v494_v7 = vadd.f32 %v492_v1, %v473_v4 }
 0x106   :  { %v475_v10 = vpop.f32.mrf.mxu0 }
 0x107   :  { %v482_v11 = vrot.slane %v480_v6, 7  ;;  %v496_v12 = vrot.slane %v494_v7, 3 }
 0x108   :  { %v620_v13 = vpop.f32.mrf.mxu0 }
 0x109   :  { %v485_v14 = vsel %vm484_vm1, %v478_v8, %v482_v11  ;;  %v498_v15 = vsel %vm484_vm1, %v489_v9, %v496_v12 }
 0x10a   :  { %v487_v16 = vsel %vm486_vm2, %v485_v14, 0.0  ;;  %v499_v17 = vsel %vm486_vm2, %v498_v15, 0.0 }
 0x10b   :  { %488 = vst [vmem:[%s856_s5] sm:$0xff] %v487_v16  ;;  %547 = vst [vmem:[%s856_s5 + $0x8] sm:$0xff] %v499_v17 }

// kernel: vit_forward.4
= control target key start
LH: loop header
LB: loop body
LE: loop exit
PB: predicated region body
PF: predicated region fallthrough
CT: control target
= control target key end

     0   :  { %s3247_s18 = smov 0   ;;  %s3771_s0 = inlined_call_operand.vmem [shape: f32[2,8,128], index: 0, kind: input, shape index: {}]   ;;  %s3772_s1 = inlined_call_operand.vmem [shape: f32[2,1,128], index: 1, kind: input, shape index: {}]   ;;  %s3773_s2 = inlined_call_operand.vmem [shape: f32[2,1,128], index: 2, kind: input, shape index: {}]   ;;  %s3774_s3 = inlined_call_operand.vmem [shape: bf16[2,128,384], index: 3, kind: input, shape index: {}]   ;;  %s3775_s4 = inlined_call_operand.vmem [shape: f32[2,1,384], index: 4, kind: input, shape index: {}]   ;;  %s3776_s5 = inlined_call_operand.vmem [shape: bf16[2,128,128], index: 5, kind: input, shape index: {}]   ;;  %s3777_s6 = inlined_call_operand.vmem [shape: f32[2,1,128], index: 6, kind: input, shape index: {}]   ;;  %s3778_s7 = inlined_call_operand.vmem [shape: f32[2,1,128], index: 7, kind: input, shape index: {}]   ;;  %s3779_s8 = inlined_call_operand.vmem [shape: f32[2,1,128], index: 8, kind: input, shape index: {}]   ;;  %s3780_s9 = inlined_call_operand.vmem [shape: f32[2,1,128], index: 9, kind: input, shape index: {}]   ;;  %s3781_s10 = inlined_call_operand.vmem [shape: bf16[2,128,512], index: 10, kind: input, shape index: {}]   ;;  %s3782_s11 = inlined_call_operand.vmem [shape: f32[2,1,512], index: 11, kind: input, shape index: {}]   ;;  %s3783_s12 = inlined_call_operand.vmem [shape: bf16[2,512,128], index: 12, kind: input, shape index: {}]   ;;  %s3784_s13 = inlined_call_operand.vmem [shape: f32[2,1,128], index: 13, kind: input, shape index: {}]   ;;  %s3785_s14 = inlined_call_operand.vmem [shape: f32[2,1,128], index: 14, kind: input, shape index: {}]   ;;  %s3786_s15 = inlined_call_operand.vmem [shape: f32[2,8,128], index: 15, kind: output, shape index: {}]  }
   0x1   :  { %3791 = sst [smem:[#allocation3_spill]] %s3771_s0 }
   0x2   :  { %3792 = sst [smem:[#allocation4_spill]] %s3772_s1 }
   0x3   :  { %3793 = sst [smem:[#allocation5_spill]] %s3773_s2 }
   0x4   :  { %3794 = sst [smem:[#allocation6_spill]] %s3774_s3 }
   0x5   :  { %3795 = sst [smem:[#allocation7_spill]] %s3775_s4 }
   0x6   :  { %3796 = sst [smem:[#allocation8_spill]] %s3776_s5 }
   0x7   :  { %3797 = sst [smem:[#allocation9_spill]] %s3786_s15 }
   0x8 LB: > { %3798 = sst [smem:[#allocation2_spill]] %s3160_s18  ;;  %s2662_s19 = sadd.s32 4294967295, %s3160_s18   ;;  %s3160_s18 = sphi %s3247_s18, %s25_s18  }
   0x9   : > { %p2665_p0 = scmp.ge.s32.totalorder %s3160_s18, 1  ;;  %p544_p1 = scmp.lt.s32.totalorder %s3160_s18, 3 }
   0xb   : > { %p545_p2 = pnand %p2665_p0, %p544_p1 }
   0xc   : > { %p634_p3 = scmp.lt.s32.totalorder (!%p545_p2), %s2662_s19, 1  ;;  %s3801_s5 = sld [smem:[#allocation8_spill]] (!%p545_p2) }
   0xd   : > { %548 = sbr.rel (%p545_p2) target bundleno = 2899 (0xb53), region = 80  ;;  %s3802_s3 = sld [smem:[#allocation6_spill]] (!%p545_p2) }
   0xe   : > { %s3803_s4 = sld [smem:[#allocation7_spill]] (!%p545_p2)  ;;  %p2674_p4 = scmp.ne.s32.totalorder (!%p545_p2), %s2662_s19, 0 }
  0x12   : > { %s3255_s20 = scalar_select %p634_p3, %s2662_s19, 1 }
  0x13   : > { %s3805_s15 = sld [smem:[#allocation9_spill]] (!%p2674_p4) }
  0x14   : > { %s2958_s27 = smul.u32 192, %s3255_s20  ;;  %s2789_s28 = sshll.u32 %s3255_s20, 6 }
  0x15   : > { %s2959_s29 = smul.u32 3, %s3255_s20  ;;  %s3271_s17 = scalar_lea.vmem %s3801_s5, %s2789_s28 }
  0x16   : > { %s3276_s18 = scalar_lea.vmem %s3802_s3, %s2958_s27  ;;  %s2790_s3 = sshll.u32 %s3255_s20, 8 }
  0x17   : > { %s3285_s2 = scalar_lea.vmem %s3803_s4, %s2959_s29  ;;  %s2671_s1 = sshll.u32 %s3255_s20, 2 }
  0x18   : > { %s3304_s26 = scalar_lea.vmem %s3781_s10, %s2790_s3  ;;  %s3309_s0 = scalar_lea.vmem %s3782_s11, %s2671_s1 }
  0x19   : > { %s3314_s28 = scalar_lea.vmem %s3783_s12, %s2790_s3  ;;  %s682_s27 = scalar_lea.vmem %s3784_s13, %s3255_s20 }
  0x1a   : > { %s685_s24 = scalar_lea.vmem %s3785_s14, %s3255_s20  ;;  %690 = sbr.rel (%p2674_p4) target bundleno = 35 (0x23), region = 84 }
  0x1b   : > { %s3804_s29 = sld [smem:[#allocation3_spill]] (!%p2674_p4) }
  0x21   : > { %v691_v0 = vld [vmem:[%s3804_s29] sm:$0xff]  ;;  %v692_v1 = vld [vmem:[%s3804_s29 + $0x8] sm:$0xff] }
  0x22   : > { %693 = vst [vmem:[%s3805_s15] sm:$0xff] %v691_v0  ;;  %694 = vst [vmem:[%s3805_s15 + $0x8] sm:$0xff] %v692_v1 }
  0x23 PF: > { %s3806_s22 = sld [smem:[#allocation9_spill]]  ;;  %v2978_v4 = vld [vmem:[%s3276_s18 + $0xac] ss:$12 sps:$4 sm:$0xff]   ;;  %v2980_v5 = vld [vmem:[%s3276_s18 + $0xa8] ss:$12 sps:$4 sm:$0xff]   ;;  %v3162_v6 = vmov 0.0   ;;  %v773_v55 = vlaneseq  ;;  %s3811_s19 = scalar_lea.vmem %s3777_s6, %s3255_s20 }
  0x24   : > { %2870 = vmatprep.subr.bf16.mxu1 %v3162_v6  ;;  %v2981_v7 = vld [vmem:[%s3276_s18 + $0xb0] ss:$12 sps:$4 sm:$0xff]   ;;  %916 = vmatprep.subr.bf16.mxu0 %v2978_v4  ;;  %v2982_v16 = vld [vmem:[%s3276_s18 + $0x94] ss:$12 sps:$4 sm:$0xff]   ;;  %v2985_v18 = vld [vmem:[%s3276_s18 + $0x98] ss:$12 sps:$4 sm:$0xff]   ;;  %s3814_s15 = scalar_lea.vmem %s3780_s9, %s3255_s20 }
  0x25   : > { %917 = vmatpush1.bf16.msra.mxu0 %v2980_v5  ;;  %2871 = vmatpush3.bf16.msra.mxu1 %v2981_v7  ;;  %v2984_v17 = vld [vmem:[%s3276_s18 + $0x90] ss:$12 sps:$4 sm:$0xff]   ;;  %v2988_v20 = vld [vmem:[%s3276_s18 + $0x78] ss:$12 sps:$4 sm:$0xff]   ;;  %v2989_v21 = vld [vmem:[%s3276_s18 + $0x80] ss:$12 sps:$4 sm:$0xff]  }
  0x26   : > { %2872 = vmatprep.subr.bf16.mxu1 %v3162_v6  ;;  %918 = vmatprep.subr.bf16.mxu0 %v2982_v16  ;;  %v2986_v19 = vld [vmem:[%s3276_s18 + $0x7c] ss:$12 sps:$4 sm:$0xff]   ;;  %v2990_v22 = vld [vmem:[%s3276_s18 + $0x64] ss:$12 sps:$4 sm:$0xff]   ;;  %v2992_v23 = vld [vmem:[%s3276_s18 + $0x60] ss:$12 sps:$4 sm:$0xff]  }
  0x27   : > { %v2993_v24 = vld [vmem:[%s3276_s18 + $0x68] ss:$12 sps:$4 sm:$0xff]   ;;  %v2994_v25 = vld [vmem:[%s3276_s18 + $0x4c] ss:$12 sps:$4 sm:$0xff]   ;;  %v2997_v27 = vld [vmem:[%s3276_s18 + $0x50] ss:$12 sps:$4 sm:$0xff]  }
  0x28   : > { %v2996_v26 = vld [vmem:[%s3276_s18 + $0x48] ss:$12 sps:$4 sm:$0xff]   ;;  %v3163_v29 = vmov 0   ;;  %vm3164_vm0 = vmmov 0   ;;  %v3000_v30 = vld [vmem:[%s3276_s18 + $0x30] ss:$12 sps:$4 sm:$0xff]  }
  0x29   : > { %v3339_v2 = vld [vmem:[%s3806_s22] sm:$0xff]  ;;  %v3344_v3 = vld [vmem:[%s3806_s22 + $0x8] sm:$0xff]  ;;  %919 = vmatpush1.bf16.msra.mxu0 %v2984_v17  ;;  %2873 = vmatpush3.bf16.msra.mxu1 %v2985_v18  ;;  %s3807_s25 = sld [smem:[#allocation4_spill]]  ;;  %v3411_v56 = vshrl.u32 %v773_v55, 7  ;;  %vm1007_vm1 = vcmask 523264   ;;  %vm1071_vm2 = vcmask 1043456  }
  0x2a   : > { %699 = vadd.xlane.f32.xlu0 %v3339_v2  ;;  %2874 = vmatprep.subr.bf16.mxu1 %v3162_v6  ;;  %v2998_v28 = vld [vmem:[%s3276_s18 + $0x34] ss:$12 sps:$4 sm:$0xff]   ;;  %v3001_v31 = vld [vmem:[%s3276_s18 + $0x38] ss:$12 sps:$4 sm:$0xff]   ;;  %v3002_v32 = vld [vmem:[%s3276_s18 + $0x1c] ss:$12 sps:$4 sm:$0xff]  }
  0x2b   : > { %920 = vmatprep.subr.bf16.mxu0 %v2986_v19  ;;  %948 = vmatprep.mubr.bf16.mxu0 %v3163_v29  ;;  %v3004_v33 = vld [vmem:[%s3276_s18 + $0x18] ss:$12 sps:$4 sm:$0xff]   ;;  %v3005_v34 = vld [vmem:[%s3276_s18 + $0x20] ss:$12 sps:$4 sm:$0xff]   ;;  %v3009_v37 = vld [vmem:[%s3276_s18 + $0x8] ss:$12 sps:$4 sm:$0xff]  }
  0x2c   : > { %2886 = vmatprep.mubr.msk.bf16.mxu1 %vm3164_vm0, %v3162_v6  ;;  %v3006_v35 = vld [vmem:[%s3276_s18 + $0x4] ss:$12 sps:$4 sm:$0xff]   ;;  %v3008_v36 = vld [vmem:[%s3276_s18] ss:$12 sps:$4 sm:$0xff]   ;;  %s3809_s16 = sld [smem:[#allocation5_spill]]  ;;  %v779_v57 = vsub.s32 1, %v3411_v56  ;;  %s3812_s18 = scalar_lea.vmem %s3778_s7, %s3255_s20 }
  0x2d   : > { %921 = vmatpush1.bf16.msra.mxu0 %v2988_v20  ;;  %2875 = vmatpush3.bf16.msra.mxu1 %v2989_v21  ;;  %v775_v58 = vsub.s32 0, %v3411_v56  ;;  %v771_v59 = vld [vmem:[%s3285_s2] sm:$0x7]  ;;  %v783_v60 = vsub.s32 2, %v3411_v56  ;;  %vm1054_vm4 = vcmask 64512   ;;  %s3166_s2 = smov 64  }
  0x2e   : > { %701 = vadd.xlane.f32.xlu0 %v3344_v3  ;;  %2876 = vmatprep.subr.bf16.mxu1 %v3162_v6  ;;  %v780_v61 = vrot.slane %v771_v59, %v779_v57 }
  0x2f   : > { %922 = vmatprep.subr.bf16.mxu0 %v2990_v22  ;;  %s3808_s3 = scalar_lea.vmem %s3807_s25, %s3255_s20  ;;  %v776_v0 = vrot.slane %v771_v59, %v775_v58  ;;  %v784_v5 = vrot.slane %v771_v59, %v783_v60  ;;  %s3813_s25 = scalar_lea.vmem %s3779_s8, %s3255_s20 }
  0x30   : > { %v2675_v46 = vld [vmem:[%s3808_s3] ss:$0 sm:$0xff] }
  0x31   : > { %923 = vmatpush1.bf16.msra.mxu0 %v2992_v23  ;;  %2877 = vmatpush3.bf16.msra.mxu1 %v2993_v24 }
  0x32   : > { %924 = vmatprep.subr.bf16.mxu0 %v2994_v25  ;;  %2878 = vmatprep.subr.bf16.mxu1 %v3162_v6  ;;  %s3810_s21 = scalar_lea.vmem %s3809_s16, %s3255_s20 }
  0x33   : > { %v2676_v50 = vld [vmem:[%s3810_s21] ss:$0 sm:$0xff] }
  0x35   : > { %925 = vmatpush1.bf16.msra.mxu0 %v2996_v26  ;;  %2879 = vmatpush3.bf16.msra.mxu1 %v2997_v27  ;;  %v1001_v27 = vand.u32 127, %v773_v55 }
  0x36   : > { %926 = vmatprep.subr.bf16.mxu0 %v2998_v28  ;;  %2880 = vmatprep.subr.bf16.mxu1 %v3162_v6  ;;  %v3165_v28 = vmov -1e+30  }
  0x37   : > { %vm1002_vm3 = vcmp.lt.s32.totalorder %v1001_v27, 5 }
  0x39   : > { %927 = vmatpush1.bf16.msra.mxu0 %v3000_v30  ;;  %2881 = vmatpush3.bf16.msra.mxu1 %v3001_v31  ;;  %v3440_v30 = vsel %vm1002_vm3, 0.0, %v3165_v28 }
  0x3a   : > { %928 = vmatprep.subr.bf16.mxu0 %v3002_v32  ;;  %2882 = vmatprep.subr.bf16.mxu1 %v3162_v6 }
  0x3d   : > { %929 = vmatpush1.bf16.msra.mxu0 %v3004_v33  ;;  %2883 = vmatpush3.bf16.msra.mxu1 %v3005_v34 }
  0x3e   : > { %930 = vmatprep.subr.bf16.mxu0 %v3006_v35  ;;  %2884 = vmatprep.subr.bf16.mxu1 %v3162_v6 }
  0x41   : > { %931 = vmatpush1.bf16.msra.mxu0 %v3008_v36  ;;  %2885 = vmatpush3.bf16.msra.mxu1 %v3009_v37 }
  0x42   : > { %2890 = vmatprep.subr.bf16.mxu1 %v3162_v6  ;;  %2914 = vmatprep.subr.bf16.mxu0 %v3162_v6 }
  0xb3   : > { %v700_v8 = vpop.xlane.xlu0 %699 }
  0xb4   : > { %v704_v9 = vmul.f32 0.0078125, %v700_v8 }
  0xb6   : > { %v3354_v10 = vsub.f32 %v3339_v2, %v704_v9 }
  0xb7   : > { %v702_v11 = vpop.xlane.xlu0 %701 }
  0xb8   : > { %v705_v12 = vmul.f32 0.0078125, %v702_v11  ;;  %v708_v13 = vmul.f32 %v3354_v10, %v3354_v10 }
  0xba   : > { %v3359_v14 = vsub.f32 %v3344_v3, %v705_v12  ;;  %710 = vadd.xlane.f32.xlu1 %v708_v13 }
  0xbc   : > { %v709_v15 = vmul.f32 %v3359_v14, %v3359_v14 }
  0xbe   : > { %712 = vadd.xlane.f32.xlu1 %v709_v15 }
 0x143   : > { %v711_v38 = vpop.xlane.xlu1 %710 }
 0x144   : > { %v714_v39 = vmul.f32 0.0078125, %v711_v38 }
 0x146   : > { %v716_v40 = vadd.f32 1e-06, %v714_v39 }
 0x147   : > { %v713_v41 = vpop.xlane.xlu1 %712 }
 0x148   : > { %3098 = vrsqrt.f32 %v716_v40  ;;  %v715_v42 = vmul.f32 0.0078125, %v713_v41 }
 0x14a   : > { %v717_v43 = vadd.f32 1e-06, %v715_v42 }
 0x14c   : > { %3100 = vrsqrt.f32 %v717_v43 }
 0x155   : > { %v3099_v44 = vpop.eup %3098 }
 0x156   : > { %v720_v45 = vmul.f32 %v3099_v44, %v3354_v10 }
 0x158   : > { %v728_v49 = vmul.f32 %v2675_v46, %v720_v45 }
 0x159   : > { %v3101_v47 = vpop.eup %3100 }
 0x15a   : > { %v721_v48 = vmul.f32 %v3101_v47, %v3359_v14  ;;  %v736_v52 = vadd.f32 %v2676_v50, %v728_v49 }
 0x15c   : > { %v729_v51 = vmul.f32 %v2675_v46, %v721_v48 }
 0x15e   : > { %v737_v53 = vadd.f32 %v2676_v50, %v729_v51 }
 0x160   : > { %v738_v54 = vpack.c.bf16 %v737_v53, %v736_v52 }
 0x162   : > { %949 = vmatmul.mubr.bf16.vlgmr.msra.gmra.mxu0 %v738_v54  ;;  %2887 = vmatmul.mubr.bf16.vlgmr.msra.gmra.mxu1 %v738_v54 }
 0x163   : > { %2892 = vmatprep.mubr.msk.bf16.mxu1 %vm3164_vm0, %v3162_v6  ;;  %2916 = vmatprep.mubr.msk.bf16.mxu0 %vm3164_vm0, %v3162_v6 }
 0x222   : > { %v950_v62 = vpop.f32.mrf.mxu0  ;;  %v993_v63 = vpop.f32.mrf.mxu1 }
 0x223   : > { %v951_v10 = vadd.f32 %v950_v62, %v776_v0  ;;  %v994_v15 = vadd.f32 %v993_v63, %v784_v5 }
 0x224   : > { %v952_v1 = vpop.f32.mrf.mxu0  ;;  %v2888_v4 = vpop.f32.mrf.mxu1 }
 0x225   : > { %v953_v7 = vadd.f32 %v952_v1, %v780_v61  ;;  %v1004_v18 = vmul.f32 0.125, %v951_v10  ;;  %v3427_v21 = vpack.c.bf16 %v994_v15, %v994_v15 }
 0x226   : > { %v954_v8 = vpop.f32.mrf.mxu0  ;;  %v996_v9 = vpop.f32.mrf.mxu1 }
 0x227   : > { %v1006_v11 = vpack.c.bf16 %v953_v7, %v953_v7  ;;  %v3423_v12 = vadd.f32 %v996_v9, %v784_v5  ;;  %v955_v19 = vadd.f32 %v954_v8, %v776_v0  ;;  %v1005_v23 = vpack.c.bf16 %v1004_v18, %v1004_v18 }
 0x228   : > { %v956_v13 = vpop.f32.mrf.mxu0  ;;  %v2889_v14 = vpop.f32.mrf.mxu1  ;;  %v1073_v25 = vsel %vm1071_vm2, %v3427_v21, 0 }
 0x229   : > { %v1012_v16 = vsel %vm1007_vm1, %v1006_v11, 0  ;;  %v957_v17 = vadd.f32 %v956_v13, %v780_v61  ;;  %v1233_v24 = vmul.f32 0.125, %v955_v19 }
 0x22a   : > { %2891 = vmatpush3.bf16.xpose.msra.mxu1 %v1012_v16 }
 0x22b   : > { %v1235_v20 = vpack.c.bf16 %v957_v17, %v957_v17  ;;  %2896 = vmatprep.subr.bf16.mxu1 %v3162_v6  ;;  %v1234_v26 = vpack.c.bf16 %v1233_v24, %v1233_v24 }
 0x22d   : > { %v1240_v22 = vsel %vm1007_vm1, %v1235_v20, 0 }
 0x22e   : > { %2915 = vmatpush3.bf16.xpose.msra.mxu0 %v1240_v22 }
 0x22f   : > { %2926 = vmatprep.subr.bf16.mxu0 %v3162_v6 }
 0x231   : > { %2893 = vmatmul.mubr.msk.bf16.vlgmr.msra.gmra.mxu1 %vm1007_vm1, %v1005_v23 }
 0x232   : > { %2897 = vmatpush3.bf16.msra.mxu1 %v1073_v25  ;;  %2898 = vmatprep.mubr.msk.bf16.mxu1 %vm3164_vm0, %v3162_v6 }
 0x233   : > { %2902 = vmatprep.subr.bf16.mxu1 %v3162_v6 }
 0x235   : > { %2917 = vmatmul.mubr.msk.bf16.vlgmr.msra.gmra.mxu0 %vm1007_vm1, %v1234_v26 }
 0x236   : > { %2928 = vmatprep.mubr.msk.bf16.mxu0 %vm3164_vm0, %v3162_v6 }
 0x2f1   : > { %v1048_v31 = vpop.f32.mrf.mxu1 }
 0x2f2   : > { %v1049_v32 = vadd.f32 %v1048_v31, %v3440_v30 }
 0x2f3   : > { %v2894_v33 = vpop.f32.mrf.mxu1 }
 0x2f4   : > { %v1055_v34 = vsel %vm1054_vm4, %v1049_v32, -inf }
 0x2f5   : > { %v1276_v35 = vpop.f32.mrf.mxu0  ;;  %1056 = vmax.xlane.f32.xlu0 %v1055_v34  ;;  %v1051_v36 = vpop.f32.mrf.mxu1 }
 0x2f6   : > { %v1277_v46 = vadd.f32 %v1276_v35, %v3440_v30  ;;  %v1294_v35 = vpack.c.bf16 %v3423_v12, %v3423_v12 }
 0x2f7   : > { %v2895_v37 = vpop.f32.mrf.mxu1  ;;  %v2918_v38 = vpop.f32.mrf.mxu0 }
 0x2f8   : > { %v1282_v47 = vsel %vm1054_vm4, %v1277_v46, -inf }
 0x2f9   : > { %v1279_v39 = vpop.f32.mrf.mxu0 }
 0x2fb   : > { %v2919_v40 = vpop.f32.mrf.mxu0 }
 0x30b   : > { %1119 = vrot.lane.b32.xlu0 %v1006_v11, %s3166_s2 }
 0x37e   : > { %v1057_v41 = vpop.xlane.xlu0 %1056 }
 0x37f   : > { %v1058_v42 = vsub.f32 %v1049_v32, %v1057_v41 }
 0x381   : > { %v1059_v43 = vmul.f32 1.442695, %v1058_v42 }
 0x382   : > { %v1120_v54 = vpop.permute.xlu0 %1119 }
 0x383   : > { %3102 = vpow2.f32 %v1059_v43  ;;  %v1125_v61 = vsel %vm1007_vm1, %v1120_v54, 0  ;;  %v3013_v54 = vld [vmem:[%s3271_s17 + $0x20] sm:$0xff]  }
 0x390   : > { %v3103_v44 = vpop.eup %3102 }
 0x391   : > { %v1061_v45 = vsel %vm1054_vm4, %v3103_v44, 0.0 }
 0x392   : > { %1062 = vadd.xlane.f32.xlu1 %v1061_v45 }
 0x3a3   : > { %1116 = vrot.lane.b32.xlu1 %v1005_v23, %s3166_s2 }
 0x3a7   : > { %1345 = vrot.lane.b32.xlu1 %v1235_v20, %s3166_s2 }
 0x3ab   : > { %1342 = vrot.lane.b32.xlu1 %v1234_v26, %s3166_s2 }
 0x3cf   : > { %1283 = vmax.xlane.f32.xlu1 %v1282_v47 }
 0x41b   : > { %v1063_v48 = vpop.xlane.xlu1 %1062 }
 0x41c   : > { %3104 = vrcp.f32 %v1063_v48 }
 0x41f   : > { %v1117_v49 = vpop.permute.xlu1 %1116 }
 0x423   : > { %v1346_v50 = vpop.permute.xlu1 %1345 }
 0x424   : > { %v1351_v51 = vsel %vm1007_vm1, %v1346_v50, 0 }
 0x425   : > { %2927 = vmatpush3.bf16.xpose.msra.mxu0 %v1351_v51  ;;  %v3010_v51 = vld [vmem:[%s3271_s17 + $0x38] sm:$0xff]  }
 0x426   : > { %2938 = vmatprep.subr.bf16.mxu0 %v3162_v6 }
 0x427   : > { %v1343_v55 = vpop.permute.xlu1 %1342 }
 0x429   : > { %v3105_v52 = vpop.eup %3104 }
 0x42a   : > { %v1065_v53 = vmul.f32 %v3105_v52, %v3103_v44  ;;  %v1299_v44 = vsel %vm1071_vm2, %v1294_v35, 0  ;;  %v3011_v52 = vld [vmem:[%s3271_s17 + $0x30] sm:$0xff]  }
 0x42c   : > { %2929 = vmatmul.mubr.msk.bf16.vlgmr.msra.gmra.mxu0 %vm1007_vm1, %v1343_v55  ;;  %v1066_v59 = vpack.c.bf16 %v1065_v53, %v1065_v53  ;;  %v3012_v53 = vld [vmem:[%s3271_s17 + $0x28] sm:$0xff]   ;;  %v3014_v55 = vld [vmem:[%s3271_s17 + $0x18] sm:$0xff]  }
 0x42d   : > { %2954 = vmatprep.mubr.msk.bf16.mxu0 %vm3164_vm0, %v3162_v6  ;;  %2939 = vmatpush3.bf16.msra.mxu0 %v3010_v51  ;;  %v3038_v51 = vld [vmem:[%s3304_s26 + $0x84] ss:$16 sps:$4 sm:$0xff]  }
 0x42e   : > { %2899 = vmatmul.mubr.msk.bf16.vlgmr.msra.gmra.mxu1 %vm1054_vm4, %v1066_v59  ;;  %2940 = vmatprep.subr.bf16.mxu0 %v3162_v6  ;;  %v3015_v59 = vld [vmem:[%s3271_s17 + $0x10] sm:$0xff]  }
 0x42f   : > { %2903 = vmatpush3.bf16.xpose.msra.mxu1 %v1125_v61  ;;  %2904 = vmatprep.mubr.msk.bf16.mxu1 %vm3164_vm0, %v3162_v6  ;;  %v3016_v61 = vld [vmem:[%s3271_s17 + $0x8] sm:$0xff]  }
 0x430   : > { %2908 = vmatprep.subr.bf16.mxu1 %v3162_v6 }
 0x431   : > { %2941 = vmatpush3.bf16.msra.mxu0 %v3011_v52  ;;  %v3039_v52 = vld [vmem:[%s3304_s26 + $0x88] ss:$16 sps:$4 sm:$0xff]  }
 0x432   : > { %2942 = vmatprep.subr.bf16.mxu0 %v3162_v6 }
 0x435   : > { %2943 = vmatpush3.bf16.msra.mxu0 %v3012_v53  ;;  %v3041_v53 = vld [vmem:[%s3304_s26 + $0x8c] ss:$16 sps:$4 sm:$0xff]  }
 0x436   : > { %2905 = vmatmul.mubr.msk.bf16.vlgmr.msra.gmra.mxu1 %vm1007_vm1, %v1117_v49  ;;  %2944 = vmatprep.subr.bf16.mxu0 %v3162_v6 }
 0x437   : > { %2910 = vmatprep.mubr.msk.bf16.mxu1 %vm3164_vm0, %v3162_v6 }
 0x439   : > { %2945 = vmatpush3.bf16.msra.mxu0 %v3013_v54  ;;  %v3044_v54 = vld [vmem:[%s3304_s26 + $0x64] ss:$16 sps:$4 sm:$0xff]  }
 0x43a   : > { %2946 = vmatprep.subr.bf16.mxu0 %v3162_v6 }
 0x43d   : > { %2947 = vmatpush3.bf16.msra.mxu0 %v3014_v55  ;;  %v3047_v55 = vld [vmem:[%s3304_s26 + $0x6c] ss:$16 sps:$4 sm:$0xff]  }
 0x43e   : > { %2948 = vmatprep.subr.bf16.mxu0 %v3162_v6 }
 0x441   : > { %2949 = vmatpush3.bf16.msra.mxu0 %v3015_v59  ;;  %v3042_v59 = vld [vmem:[%s3304_s26 + $0x60] ss:$16 sps:$4 sm:$0xff]  }
 0x442   : > { %2950 = vmatprep.subr.bf16.mxu0 %v3162_v6 }
 0x445   : > { %2951 = vmatpush3.bf16.msra.mxu0 %v3016_v61  ;;  %v3045_v61 = vld [vmem:[%s3304_s26 + $0x68] ss:$16 sps:$4 sm:$0xff]  }
 0x446   : > { %2952 = vmatprep.subr.bf16.mxu0 %v3162_v6 }
 0x458   : > { %v1284_v62 = vpop.xlane.xlu1 %1283 }
 0x459   : > { %v1285_v63 = vsub.f32 %v1277_v46, %v1284_v62 }
 0x45b   : > { %v1286_v1 = vmul.f32 1.442695, %v1285_v63 }
 0x45d   : > { %3106 = vpow2.f32 %v1286_v1 }
 0x46a   : > { %v3107_v22 = vpop.eup %3106 }
 0x46b   : > { %v1288_v23 = vsel %vm1054_vm4, %v3107_v22, 0.0 }
 0x4ec   : > { %v1387_v0 = vpop.f32.mrf.mxu0 }
 0x4ed   : > { %v1388_v16 = vadd.f32 %v1387_v0, %v3440_v30 }
 0x4ee   : > { %v3464_v4 = vpop.f32.mrf.mxu1  ;;  %v2930_v5 = vpop.f32.mrf.mxu0 }
 0x4ef   : > { %v1393_v20 = vsel %vm1054_vm4, %v1388_v16, -inf  ;;  %v3017_v5 = vld [vmem:[%s3271_s17] sm:$0xff]  }
 0x4f0   : > { %v2900_v7 = vpop.f32.mrf.mxu1  ;;  %v1390_v8 = vpop.f32.mrf.mxu0  ;;  %2953 = vmatpush3.bf16.msra.mxu0 %v3017_v5  ;;  %v3056_v5 = vld [vmem:[%s3304_s26 + $0x24] ss:$16 sps:$4 sm:$0xff]  }
 0x4f2   : > { %v1112_v9 = vpop.f32.mrf.mxu1  ;;  %v2931_v10 = vpop.f32.mrf.mxu0 }
 0x4f4   : > { %v2901_v11 = vpop.f32.mrf.mxu1 }
 0x4f6   : > { %v1161_v13 = vpop.f32.mrf.mxu1 }
 0x4f7   : > { %v1162_v14 = vadd.f32 %v1161_v13, %v3440_v30 }
 0x4f8   : > { %v2906_v15 = vpop.f32.mrf.mxu1 }
 0x4f9   : > { %v1167_v17 = vsel %vm1054_vm4, %v1162_v14, -inf }
 0x4fa   : > { %1168 = vmax.xlane.f32.xlu0 %v1167_v17  ;;  %v1164_v18 = vpop.f32.mrf.mxu1 }
 0x4fc   : > { %v2907_v19 = vpop.f32.mrf.mxu1 }
 0x4fe   : > { %1394 = vmax.xlane.f32.xlu0 %v1393_v20 }
 0x502   : > { %1289 = vadd.xlane.f32.xlu0 %v1288_v23  ;;  %v2709_v23 = vld [vmem:[%s3811_s19] ss:$0 sm:$0xff] }
 0x583   : > { %v1169_v24 = vpop.xlane.xlu0 %1168 }
 0x584   : > { %v1170_v25 = vsub.f32 %v1162_v14, %v1169_v24 }
 0x586   : > { %v1171_v26 = vmul.f32 1.442695, %v1170_v25  ;;  %v2718_v25 = vld [vmem:[%s3812_s18] ss:$0 sm:$0xff] }
 0x587   : > { %v1395_v27 = vpop.xlane.xlu0 %1394 }
 0x588   : > { %3108 = vpow2.f32 %v1171_v26  ;;  %v1396_v28 = vsub.f32 %v1388_v16, %v1395_v27 }
 0x58a   : > { %v1397_v31 = vmul.f32 1.442695, %v1396_v28 }
 0x58b   : > { %v1290_v36 = vpop.xlane.xlu0 %1289 }
 0x58c   : > { %3110 = vpow2.f32 %v1397_v31 }
 0x595   : > { %v3109_v30 = vpop.eup %3108 }
 0x596   : > { %v1173_v32 = vsel %vm1054_vm4, %v3109_v30, 0.0 }
 0x597   : > { %1174 = vadd.xlane.f32.xlu0 %v1173_v32 }
 0x599   : > { %v3111_v33 = vpop.eup %3110 }
 0x59a   : > { %v1399_v34 = vsel %vm1054_vm4, %v3111_v33, 0.0 }
 0x59b   : > { %1400 = vadd.xlane.f32.xlu1 %v1399_v34  ;;  %v3018_v34 = vld [vmem:[%s3304_s26 + $0xe0] ss:$16 sps:$4 sm:$0xff]  }
 0x5ac   : > { %1406 = vrot.lane.b32.xlu1 %v1294_v35, %s3166_s2  ;;  %v3020_v35 = vld [vmem:[%s3304_s26 + $0xe4] ss:$16 sps:$4 sm:$0xff]  }
 0x5ad   : > { %1180 = vrot.lane.b32.xlu0 %v3427_v21, %s3166_s2 }
 0x620   : > { %v1175_v37 = vpop.xlane.xlu0 %1174 }
 0x621   : > { %3112 = vrcp.f32 %v1175_v37  ;;  %v3023_v37 = vld [vmem:[%s3304_s26 + $0xec] ss:$16 sps:$4 sm:$0xff]  }
 0x622   : > { %3114 = vrcp.f32 %v1290_v36  ;;  %v3021_v36 = vld [vmem:[%s3304_s26 + $0xe8] ss:$16 sps:$4 sm:$0xff]   ;;  %1881 = vmatprep.subr.bf16.mxu0 %v3023_v37  ;;  %v3070_v37 = vld [vmem:[%s3314_s28 + $0x70] sm:$0xff]  }
 0x624   : > { %v1181_v38 = vpop.permute.xlu0 %1180  ;;  %v1401_v40 = vpop.xlane.xlu1 %1400 }
 0x625   : > { %v1186_v39 = vsel %vm1071_vm2, %v1181_v38, 0  ;;  %3116 = vrcp.f32 %v1401_v40 }
 0x626   : > { %2909 = vmatpush3.bf16.msra.mxu1 %v1186_v39 }
 0x627   : > { %2920 = vmatprep.subr.bf16.mxu1 %v3162_v6 }
 0x628   : > { %v1407_v45 = vpop.permute.xlu1 %1406 }
 0x629   : > { %v1412_v48 = vsel %vm1071_vm2, %v1407_v45, 0  ;;  %v3027_v45 = vld [vmem:[%s3304_s26 + $0xc8] ss:$16 sps:$4 sm:$0xff]  }
 0x62e   : > { %v3113_v41 = vpop.eup %3112 }
 0x62f   : > { %v1177_v42 = vmul.f32 %v3113_v41, %v3109_v30  ;;  %v3115_v43 = vpop.eup %3114 }
 0x630   : > { %v1292_v21 = vmul.f32 %v3115_v43, %v3107_v22  ;;  %v3026_v43 = vld [vmem:[%s3304_s26 + $0xc4] ss:$16 sps:$4 sm:$0xff]  }
 0x631   : > { %v1178_v12 = vpack.c.bf16 %v1177_v42, %v1177_v42 }
 0x632   : > { %v1293_v46 = vpack.c.bf16 %v1292_v21, %v1292_v21  ;;  %v3117_v47 = vpop.eup %3116  ;;  %v3024_v21 = vld [vmem:[%s3304_s26 + $0xc0] ss:$16 sps:$4 sm:$0xff]  }
 0x633   : > { %2911 = vmatmul.mubr.msk.bf16.vlgmr.msra.gmra.mxu1 %vm1054_vm4, %v1178_v12  ;;  %v1403_v49 = vmul.f32 %v3117_v47, %v3111_v33  ;;  %v3035_v47 = vld [vmem:[%s3304_s26 + $0xac] ss:$16 sps:$4 sm:$0xff]  }
 0x634   : > { %2921 = vmatpush3.bf16.msra.mxu1 %v1299_v44  ;;  %2922 = vmatprep.mubr.msk.bf16.mxu1 %vm3164_vm0, %v3162_v6  ;;  %v3029_v44 = vld [vmem:[%s3304_s26 + $0xcc] ss:$16 sps:$4 sm:$0xff]  }
 0x635   : > { %2932 = vmatprep.subr.bf16.mxu1 %v3162_v6  ;;  %v1404_v50 = vpack.c.bf16 %v1403_v49, %v1403_v49  ;;  %v3033_v49 = vld [vmem:[%s3304_s26 + $0xa8] ss:$16 sps:$4 sm:$0xff]  }
 0x63b   : > { %2923 = vmatmul.mubr.msk.bf16.vlgmr.msra.gmra.mxu1 %vm1054_vm4, %v1293_v46  ;;  %v3032_v46 = vld [vmem:[%s3304_s26 + $0xa4] ss:$16 sps:$4 sm:$0xff]  }
 0x63c   : > { %2933 = vmatpush3.bf16.msra.mxu1 %v1412_v48  ;;  %2934 = vmatprep.mubr.msk.bf16.mxu1 %vm3164_vm0, %v3162_v6  ;;  %v3030_v48 = vld [vmem:[%s3304_s26 + $0xa0] ss:$16 sps:$4 sm:$0xff]  }
 0x63d   : > { %1838 = vmatprep.subr.bf16.mxu1 %v3020_v35  ;;  %v3068_v35 = vld [vmem:[%s3314_s28 + $0x38] sm:$0xff]  }
 0x643   : > { %2935 = vmatmul.mubr.msk.bf16.vlgmr.msra.gmra.mxu1 %vm1054_vm4, %v1404_v50  ;;  %v3036_v50 = vld [vmem:[%s3304_s26 + $0x80] ss:$16 sps:$4 sm:$0xff]  }
 0x644   : > { %1870 = vmatprep.mubr.bf16.mxu1 %v3163_v29  ;;  %1839 = vmatpush1.bf16.msra.mxu1 %v3018_v34  ;;  %v3067_v34 = vld [vmem:[%s3314_s28 + $0xf8] sm:$0xff]  }
 0x645   : > { %1840 = vmatprep.subr.bf16.mxu1 %v3026_v43  ;;  %v3079_v43 = vld [vmem:[%s3314_s28 + $0xe0] sm:$0xff]  }
 0x648   : > { %1841 = vmatpush1.bf16.msra.mxu1 %v3024_v21  ;;  %v3081_v21 = vld [vmem:[%s3314_s28 + $0xa0] sm:$0xff]  }
 0x649   : > { %1842 = vmatprep.subr.bf16.mxu1 %v3032_v46  ;;  %v3083_v46 = vld [vmem:[%s3314_s28 + $0xd8] sm:$0xff]  }
 0x64c   : > { %1843 = vmatpush1.bf16.msra.mxu1 %v3030_v48  ;;  %v3085_v48 = vld [vmem:[%s3314_s28 + $0x98] sm:$0xff]  }
 0x64d   : > { %1844 = vmatprep.subr.bf16.mxu1 %v3038_v51  ;;  %v3088_v51 = vld [vmem:[%s3314_s28 + $0x10] sm:$0xff]  }
 0x650   : > { %1845 = vmatpush1.bf16.msra.mxu1 %v3036_v50  ;;  %v3087_v50 = vld [vmem:[%s3314_s28 + $0xd0] sm:$0xff]  }
 0x651   : > { %1846 = vmatprep.subr.bf16.mxu1 %v3044_v54  ;;  %v3091_v54 = vld [vmem:[%s3314_s28 + $0xc8] sm:$0xff]  }
 0x654   : > { %1847 = vmatpush1.bf16.msra.mxu1 %v3042_v59  ;;  %v3093_v59 = vld [vmem:[%s3314_s28 + $0x88] sm:$0xff]  }
 0x6f3   : > { %v1222_v62 = vpop.f32.mrf.mxu1 }
 0x6f5   : > { %v2912_v63 = vpop.f32.mrf.mxu1 }
 0x6f6   : > { %v3053_v63 = vld [vmem:[%s3304_s26 + $0x4c] ss:$16 sps:$4 sm:$0xff]  }
 0x6f7   : > { %v1225_v0 = vpop.f32.mrf.mxu1 }
 0x6f8   : > { %v3048_v0 = vld [vmem:[%s3304_s26 + $0x40] ss:$16 sps:$4 sm:$0xff]  }
 0x6f9   : > { %v2913_v1 = vpop.f32.mrf.mxu1 }
 0x6fa   : > { %v3051_v1 = vld [vmem:[%s3304_s26 + $0x48] ss:$16 sps:$4 sm:$0xff]  }
 0x6fb   : > { %v1335_v7 = vpop.f32.mrf.mxu1 }
 0x6fd   : > { %v2924_v8 = vpop.f32.mrf.mxu1 }
 0x6fe   : > { %v3054_v8 = vld [vmem:[%s3304_s26 + $0x20] ss:$16 sps:$4 sm:$0xff]  }
 0x6ff   : > { %v1338_v9 = vpop.f32.mrf.mxu1 }
 0x700   : > { %v3057_v9 = vld [vmem:[%s3304_s26 + $0x28] ss:$16 sps:$4 sm:$0xff]  }
 0x701   : > { %v2925_v10 = vpop.f32.mrf.mxu1 }
 0x702   : > { %v3062_v10 = vld [vmem:[%s3304_s26 + $0x4] ss:$16 sps:$4 sm:$0xff]  }
 0x703   : > { %v1448_v11 = vpop.f32.mrf.mxu1 }
 0x704   : > { %v2973_v13 = vpack.i.bf16 %v1448_v11, %v1222_v62  ;;  %v3050_v62 = vld [vmem:[%s3304_s26 + $0x44] ss:$16 sps:$4 sm:$0xff]   ;;  %v3065_v11 = vld [vmem:[%s3304_s26 + $0xc] ss:$16 sps:$4 sm:$0xff]  }
 0x705   : > { %v2936_v14 = vpop.f32.mrf.mxu1  ;;  %1848 = vmatprep.subr.bf16.mxu1 %v3050_v62  ;;  %v3095_v62 = vld [vmem:[%s3314_s28 + $0xc0] sm:$0xff]  }
 0x706   : > { %2974 = vrot.lane.b32.xlu1 %v2973_v13, %s3166_s2  ;;  %1849 = vmatpush1.bf16.msra.mxu1 %v3048_v0  ;;  %v3060_v13 = vld [vmem:[%s3304_s26] ss:$16 sps:$4 sm:$0xff]   ;;  %v3063_v14 = vld [vmem:[%s3304_s26 + $0x8] ss:$16 sps:$4 sm:$0xff]  }
 0x707   : > { %v1451_v15 = vpop.f32.mrf.mxu1  ;;  %1850 = vmatprep.subr.bf16.mxu1 %v3056_v5  ;;  %v3097_v0 = vld [vmem:[%s3314_s28 + $0x80] sm:$0xff]   ;;  %v1672_v5 = vsub.s32 3, %v3411_v56 }
 0x709   : > { %v2937_v16 = vpop.f32.mrf.mxu1 }
 0x70a   : > { %1851 = vmatpush1.bf16.msra.mxu1 %v3054_v8 }
 0x70b   : > { %1852 = vmatprep.subr.bf16.mxu1 %v3062_v10 }
 0x70e   : > { %1853 = vmatpush1.bf16.msra.mxu1 %v3060_v13 }
 0x778   : > { %v2975_v6 = vpop.permute.xlu1 %2974 }
 0x779   : > { %v2977_v17 = vunpack.i.h.bf16 %v2975_v6  ;;  %v2976_v18 = vunpack.i.l.bf16 %v2975_v6 }
 0x77b   : > { %v1458_v19 = vsel %vm1007_vm1, %v1335_v7, %v2977_v17  ;;  %v1232_v20 = vsel %vm1007_vm1, %v3464_v4, %v2976_v18  ;;  %v3059_v7 = vld [vmem:[%s3304_s26 + $0x2c] ss:$16 sps:$4 sm:$0xff]  }
 0x77c   : > { %v1459_v22 = vpack.c.bf16 %v1458_v19, %v1232_v20 }
 0x77e   : > { %2955 = vmatmul.mubr.bf16.vlgmr.msra.gmra.mxu0 %v1459_v22 }
 0x77f   : > { %1913 = vmatprep.mubr.bf16.mxu0 %v3163_v29  ;;  %1882 = vmatpush1.bf16.msra.mxu0 %v3021_v36  ;;  %v3069_v36 = vld [vmem:[%s3314_s28 + $0xb8] sm:$0xff]  }
 0x780   : > { %1883 = vmatprep.subr.bf16.mxu0 %v3029_v44  ;;  %v3080_v44 = vld [vmem:[%s3314_s28 + $0x20] sm:$0xff]  }
 0x783   : > { %1884 = vmatpush1.bf16.msra.mxu0 %v3027_v45  ;;  %v3082_v45 = vld [vmem:[%s3314_s28 + $0x58] sm:$0xff]  }
 0x784   : > { %1885 = vmatprep.subr.bf16.mxu0 %v3035_v47  ;;  %v3084_v47 = vld [vmem:[%s3314_s28 + $0x18] sm:$0xff]  }
 0x787   : > { %1886 = vmatpush1.bf16.msra.mxu0 %v3033_v49  ;;  %v3086_v49 = vld [vmem:[%s3314_s28 + $0x50] sm:$0xff]  }
 0x788   : > { %1887 = vmatprep.subr.bf16.mxu0 %v3041_v53  ;;  %v3090_v53 = vld [vmem:[%s3314_s28 + $0x48] sm:$0xff]  }
 0x78b   : > { %1888 = vmatpush1.bf16.msra.mxu0 %v3039_v52  ;;  %v3089_v52 = vld [vmem:[%s3314_s28 + $0x90] sm:$0xff]  }
 0x78c   : > { %1889 = vmatprep.subr.bf16.mxu0 %v3047_v55  ;;  %v3092_v55 = vld [vmem:[%s3314_s28 + $0x8] sm:$0xff]  }
 0x78f   : > { %1890 = vmatpush1.bf16.msra.mxu0 %v3045_v61  ;;  %v3094_v61 = vld [vmem:[%s3314_s28 + $0x40] sm:$0xff]  }
 0x790   : > { %1891 = vmatprep.subr.bf16.mxu0 %v3053_v63  ;;  %v3096_v63 = vld [vmem:[%s3314_s28] sm:$0xff]  }
 0x793   : > { %1892 = vmatpush1.bf16.msra.mxu0 %v3051_v1  ;;  %v1656_v1 = vld [vmem:[%s3309_s0] sm:$0xf] }
 0x794   : > { %1893 = vmatprep.subr.bf16.mxu0 %v3059_v7  ;;  %v1661_v7 = vrot.slane %v1656_v1, %v775_v58  ;;  %v1669_v8 = vrot.slane %v1656_v1, %v783_v60  ;;  %v1673_v13 = vrot.slane %v1656_v1, %v1672_v5 }
 0x797   : > { %1894 = vmatpush1.bf16.msra.mxu0 %v3057_v9 }
 0x798   : > { %1895 = vmatprep.subr.bf16.mxu0 %v3065_v11  ;;  %v1665_v11 = vrot.slane %v1656_v1, %v779_v57 }
 0x79b   : > { %1896 = vmatpush1.bf16.msra.mxu0 %v3063_v14 }
 0x79c   : > { %2848 = vmatprep.subr.bf16.mxu0 %v3067_v34 }
 0x83e   : > { %v1565_v24 = vpop.f32.mrf.mxu0 }
 0x83f   : > { %v1566_v4 = vadd.f32 %v2709_v23, %v1565_v24 }
 0x840   : > { %v2956_v26 = vpop.f32.mrf.mxu0 }
 0x841   : > { %v1579_v27 = vmul.f32 %v2718_v25, %v1566_v4  ;;  %v2720_v26 = vld [vmem:[%s3814_s15] ss:$0 sm:$0xff] }
 0x842   : > { %v1568_v28 = vpop.f32.mrf.mxu0 }
 0x843   : > { %v1569_v31 = vadd.f32 %v2709_v23, %v1568_v28  ;;  %v3522_v29 = vadd.f32 %v1579_v27, %v3339_v2  ;;  %v2719_v23 = vld [vmem:[%s3813_s25] ss:$0 sm:$0xff] }
 0x844   : > { %v2957_v30 = vpop.f32.mrf.mxu0 }
 0x845   : > { %v1580_v32 = vmul.f32 %v2718_v25, %v1569_v31  ;;  %1585 = vadd.xlane.f32.xlu1 %v3522_v29 }
 0x847   : > { %v3526_v33 = vadd.f32 %v1580_v32, %v3344_v3  ;;  %v3066_v32 = vld [vmem:[%s3314_s28 + $0x78] sm:$0xff]  }
 0x848   : > { %2826 = vmatprep.subr.bf16.mxu1 %v3066_v32 }
 0x849   : > { %1587 = vadd.xlane.f32.xlu0 %v3526_v33 }
 0x8ce   : > { %v1586_v2 = vpop.xlane.xlu1 %1585 }
 0x8cf   : > { %v1589_v38 = vmul.f32 0.0078125, %v1586_v2  ;;  %v3071_v2 = vld [vmem:[%s3314_s28 + $0xf0] sm:$0xff]  }
 0x8d1   : > { %v3534_v39 = vsub.f32 %v3522_v29, %v1589_v38  ;;  %v3072_v38 = vld [vmem:[%s3314_s28 + $0x30] sm:$0xff]  }
 0x8d2   : > { %v1588_v3 = vpop.xlane.xlu0 %1587 }
 0x8d3   : > { %v1590_v40 = vmul.f32 0.0078125, %v1588_v3  ;;  %v1593_v41 = vmul.f32 %v3534_v39, %v3534_v39  ;;  %v3074_v3 = vld [vmem:[%s3314_s28 + $0x68] sm:$0xff]  }
 0x8d5   : > { %v3539_v42 = vsub.f32 %v3526_v33, %v1590_v40  ;;  %1595 = vadd.xlane.f32.xlu0 %v1593_v41  ;;  %v3075_v40 = vld [vmem:[%s3314_s28 + $0xe8] sm:$0xff]  }
 0x8d6   : > { %v3076_v41 = vld [vmem:[%s3314_s28 + $0x28] sm:$0xff]  }
 0x8d7   : > { %v1594_v12 = vmul.f32 %v3539_v42, %v3539_v42 }
 0x8d9   : > { %1597 = vadd.xlane.f32.xlu0 %v1594_v12  ;;  %v3078_v12 = vld [vmem:[%s3314_s28 + $0x60] sm:$0xff]  }
 0x95e   : > { %v1596_v15 = vpop.xlane.xlu0 %1595 }
 0x95f   : > { %v1599_v16 = vmul.f32 0.0078125, %v1596_v15 }
 0x961   : > { %v1601_v6 = vadd.f32 1e-06, %v1599_v16 }
 0x962   : > { %v1598_v17 = vpop.xlane.xlu0 %1597 }
 0x963   : > { %3118 = vrsqrt.f32 %v1601_v6  ;;  %v1600_v18 = vmul.f32 0.0078125, %v1598_v17 }
 0x965   : > { %v1602_v19 = vadd.f32 1e-06, %v1600_v18 }
 0x967   : > { %3120 = vrsqrt.f32 %v1602_v19 }
 0x970   : > { %v3119_v20 = vpop.eup %3118 }
 0x971   : > { %v1605_v22 = vmul.f32 %v3119_v20, %v3534_v39  ;;  %v3073_v39 = vld [vmem:[%s3314_s28 + $0xb0] sm:$0xff]  }
 0x973   : > { %v1613_v4 = vmul.f32 %v2719_v23, %v1605_v22 }
 0x974   : > { %v3121_v24 = vpop.eup %3120 }
 0x975   : > { %v1606_v25 = vmul.f32 %v3121_v24, %v3539_v42  ;;  %v1621_v28 = vadd.f32 %v2720_v26, %v1613_v4  ;;  %v3077_v42 = vld [vmem:[%s3314_s28 + $0xa8] sm:$0xff]  }
 0x977   : > { %v1614_v27 = vmul.f32 %v2719_v23, %v1606_v25 }
 0x979   : > { %v1622_v31 = vadd.f32 %v2720_v26, %v1614_v27 }
 0x97b   : > { %v1623_v30 = vpack.c.bf16 %v1622_v31, %v1621_v28 }
 0x97d   : > { %1871 = vmatmul.mubr.bf16.vlgmr.msra.gmra.mxu1 %v1623_v30  ;;  %1914 = vmatmul.mubr.bf16.vlgmr.msra.gmra.mxu0 %v1623_v30 }
 0x97e   : > { %2827 = vmatpush3.bf16.msra.mxu1 %v3068_v35  ;;  %2849 = vmatpush3.bf16.msra.mxu0 %v3069_v36 }
 0x97f   : > { %2828 = vmatprep.subr.bf16.mxu1 %v3070_v37  ;;  %2850 = vmatprep.subr.bf16.mxu0 %v3071_v2 }
 0x982   : > { %2829 = vmatpush3.bf16.msra.mxu1 %v3072_v38  ;;  %2851 = vmatpush3.bf16.msra.mxu0 %v3073_v39 }
 0x983   : > { %2830 = vmatprep.subr.bf16.mxu1 %v3074_v3  ;;  %2852 = vmatprep.subr.bf16.mxu0 %v3075_v40 }
 0x986   : > { %2831 = vmatpush3.bf16.msra.mxu1 %v3076_v41  ;;  %2853 = vmatpush3.bf16.msra.mxu0 %v3077_v42 }
 0x987   : > { %2832 = vmatprep.subr.bf16.mxu1 %v3078_v12  ;;  %2854 = vmatprep.subr.bf16.mxu0 %v3079_v43 }
 0x98a   : > { %2833 = vmatpush3.bf16.msra.mxu1 %v3080_v44  ;;  %2855 = vmatpush3.bf16.msra.mxu0 %v3081_v21 }
 0x98b   : > { %2834 = vmatprep.subr.bf16.mxu1 %v3082_v45  ;;  %2856 = vmatprep.subr.bf16.mxu0 %v3083_v46 }
 0x98e   : > { %2835 = vmatpush3.bf16.msra.mxu1 %v3084_v47  ;;  %2857 = vmatpush3.bf16.msra.mxu0 %v3085_v48 }
 0x98f   : > { %2836 = vmatprep.subr.bf16.mxu1 %v3086_v49  ;;  %2858 = vmatprep.subr.bf16.mxu0 %v3087_v50 }
 0x992   : > { %2837 = vmatpush3.bf16.msra.mxu1 %v3088_v51  ;;  %2859 = vmatpush3.bf16.msra.mxu0 %v3089_v52 }
 0x993   : > { %2838 = vmatprep.subr.bf16.mxu1 %v3090_v53  ;;  %2860 = vmatprep.subr.bf16.mxu0 %v3091_v54 }
 0x996   : > { %2839 = vmatpush3.bf16.msra.mxu1 %v3092_v55  ;;  %2861 = vmatpush3.bf16.msra.mxu0 %v3093_v59 }
 0x997   : > { %2840 = vmatprep.subr.bf16.mxu1 %v3094_v61  ;;  %2862 = vmatprep.subr.bf16.mxu0 %v3095_v62 }
 0x99a   : > { %2841 = vmatpush3.bf16.msra.mxu1 %v3096_v63  ;;  %2863 = vmatpush3.bf16.msra.mxu0 %v3097_v0 }
 0xa3d   : > { %v1872_v9 = vpop.f32.mrf.mxu1  ;;  %v1915_v10 = vpop.f32.mrf.mxu0 }
 0xa3e   : > { %v3623_v14 = vadd.f32 %v1872_v9, %v1661_v7  ;;  %v3625_v15 = vadd.f32 %v1915_v10, %v1669_v8 }
 0xa3f   : > { %v1874_v16 = vpop.f32.mrf.mxu1  ;;  %v1917_v6 = vpop.f32.mrf.mxu0 }
 0xa40   : > { %v3628_v17 = vmul.f32 0.70710677, %v3623_v14  ;;  %v3631_v58 = vmul.f32 0.70710677, %v3625_v15  ;;  %v3633_v18 = vadd.f32 %v1874_v16, %v1665_v11  ;;  %v3635_v60 = vadd.f32 %v1917_v6, %v1673_v13 }
 0xa41   : > { %v1876_v24 = vpop.f32.mrf.mxu1  ;;  %v1919_v32 = vpop.f32.mrf.mxu0 }
 0xa42   : > { %v1940_v56 = vand.u32 2147483647, %v3628_v17  ;;  %v1942_v57 = vand.u32 2147483647, %v3631_v58  ;;  %v3640_v19 = vmul.f32 0.70710677, %v3633_v18  ;;  %v3647_v30 = vadd.f32 %v1876_v24, %v1661_v7 }
 0xa43   : > { %v3643_v20 = vmul.f32 0.70710677, %v3635_v60  ;;  %v1878_v34 = vpop.f32.mrf.mxu1  ;;  %v3652_v2 = vadd.f32 %v1919_v32, %v1669_v8  ;;  %v1921_v3 = vpop.f32.mrf.mxu0  ;;  %vm2100_vm6 = vcmp.ge.f32.partialorder %v3628_v17, 0.0  ;;  %vm2102_vm8 = vcmp.ge.f32.partialorder %v3631_v58, 0.0 }
 0xa44   : > { %v1948_v22 = vmul.f32 0.3275911, %v1940_v56  ;;  %v1950_v23 = vmul.f32 0.3275911, %v1942_v57  ;;  %v1941_v25 = vand.u32 2147483647, %v3640_v19  ;;  %v3654_v38 = vadd.f32 %v1878_v34, %v1665_v11 }
 0xa45   : > { %v1943_v4 = vand.u32 2147483647, %v3643_v20  ;;  %v3650_v37 = vmul.f32 0.70710677, %v3647_v30  ;;  %v3658_v40 = vmul.f32 0.70710677, %v3652_v2  ;;  %v3664_v43 = vadd.f32 %v1921_v3, %v1673_v13 }
 0xa46   : > { %v1956_v26 = vadd.f32 1.0, %v1948_v22  ;;  %v1958_v27 = vadd.f32 1.0, %v1950_v23  ;;  %v1949_v28 = vmul.f32 0.3275911, %v1941_v25  ;;  %v3661_v42 = vmul.f32 0.70710677, %v3654_v38 }
 0xa47   : > { %v1951_v31 = vmul.f32 0.3275911, %v1943_v4  ;;  %v1944_v39 = vand.u32 2147483647, %v3650_v37  ;;  %v1946_v12 = vand.u32 2147483647, %v3658_v40 }
 0xa48   : > { %3122 = vrcp.f32 %v1956_v26  ;;  %v1957_v35 = vadd.f32 1.0, %v1949_v28  ;;  %v2052_v44 = vsub.f32 0.0, %v1940_v56  ;;  %v1945_v45 = vand.u32 2147483647, %v3661_v42 }
 0xa49   : > { %3124 = vrcp.f32 %v1958_v27  ;;  %v1959_v36 = vadd.f32 1.0, %v1951_v31  ;;  %v1952_v41 = vmul.f32 0.3275911, %v1944_v39  ;;  %v1954_v46 = vmul.f32 0.3275911, %v1946_v12 }
 0xa4a   : > { %3126 = vrcp.f32 %v1957_v35  ;;  %v3668_v47 = vmul.f32 0.70710677, %v3664_v43  ;;  %v2054_v48 = vsub.f32 0.0, %v1942_v57  ;;  %v1953_v49 = vmul.f32 0.3275911, %v1945_v45 }
 0xa4b   : > { %3128 = vrcp.f32 %v1959_v36  ;;  %v1960_v21 = vadd.f32 1.0, %v1952_v41  ;;  %v2053_v50 = vsub.f32 0.0, %v1941_v25  ;;  %v1962_v51 = vadd.f32 1.0, %v1954_v46 }
 0xa4c   : > { %v3671_v52 = vand.u32 2147483647, %v3668_v47  ;;  %v2060_v53 = vmul.f32 %v2052_v44, %v1940_v56  ;;  %v1961_v54 = vadd.f32 1.0, %v1953_v49  ;;  %v2055_v59 = vsub.f32 0.0, %v1943_v4 }
 0xa4d   : > { %3130 = vrcp.f32 %v1960_v21  ;;  %v2062_v0 = vmul.f32 %v2054_v48, %v1942_v57  ;;  %v2061_v5 = vmul.f32 %v2053_v50, %v1941_v25  ;;  %v2056_v7 = vsub.f32 0.0, %v1944_v39 }
 0xa4e   : > { %3132 = vrcp.f32 %v1962_v51  ;;  %v1955_v61 = vmul.f32 0.3275911, %v3671_v52  ;;  %v2068_v10 = vmul.f32 1.442695, %v2060_v53  ;;  %v2063_v16 = vmul.f32 %v2055_v59, %v1943_v4 }
 0xa4f   : > { %3134 = vrcp.f32 %v1961_v54  ;;  %v2058_v6 = vsub.f32 0.0, %v1946_v12  ;;  %v2072_v22 = vmul.f32 1.442695, %v2062_v0  ;;  %v2070_v25 = vmul.f32 1.442695, %v2061_v5 }
 0xa50   : > { %v1963_v8 = vadd.f32 1.0, %v1955_v61  ;;  %v2064_v26 = vmul.f32 %v2056_v7, %v1944_v39  ;;  %v2057_v27 = vsub.f32 0.0, %v1945_v45  ;;  %v2074_v34 = vmul.f32 1.442695, %v2063_v16 }
 0xa51   : > { %v2066_v35 = vmul.f32 %v2058_v6, %v1946_v12  ;;  %v2059_v53 = vsub.f32 0.0, %v3671_v52  ;;  %vm2104_vm5 = vcmp.ge.f32.partialorder %v3650_v37, 0.0  ;;  %vm2101_vm7 = vcmp.ge.f32.partialorder %v3640_v19, 0.0 }
 0xa52   : > { %3136 = vrcp.f32 %v1963_v8  ;;  %v2076_v39 = vmul.f32 1.442695, %v2064_v26  ;;  %v2065_v46 = vmul.f32 %v2057_v27, %v1945_v45  ;;  %vm2103_vm9 = vcmp.ge.f32.partialorder %v3643_v20, 0.0 }
 0xa53   : > { %3138 = vpow2.f32 %v2068_v10  ;;  %v2080_v12 = vmul.f32 1.442695, %v2066_v35  ;;  %v2067_v6 = vmul.f32 %v2059_v53, %v3671_v52  ;;  %vm2106_vm10 = vcmp.ge.f32.partialorder %v3658_v40, 0.0 }
 0xa54   : > { %3140 = vpow2.f32 %v2072_v22  ;;  %v2078_v10 = vmul.f32 1.442695, %v2065_v46  ;;  %vm2105_vm11 = vcmp.ge.f32.partialorder %v3661_v42, 0.0  ;;  %v1924_v20 = vmul.f32 0.5, %v3623_v14 }
 0xa55   : > { %v3673_v55 = vpop.eup %3122  ;;  %3142 = vpow2.f32 %v2070_v25  ;;  %vm2107_vm12 = vcmp.ge.f32.partialorder %v3668_v47, 0.0  ;;  %v1931_v58 = vmul.f32 0.5, %v3664_v43  ;;  %v2753_v43 = vld [vmem:[%s682_s27] ss:$0 sm:$0xff] }
 0xa56   : > { %v3676_v62 = vpop.eup %3124  ;;  %v1980_v63 = vmul.f32 1.0614054, %v3673_v55  ;;  %3144 = vpow2.f32 %v2074_v34 }
 0xa57   : > { %v1982_v1 = vmul.f32 1.0614054, %v3676_v62  ;;  %v3680_v11 = vpop.eup %3126  ;;  %3146 = vpow2.f32 %v2076_v39 }
 0xa58   : > { %v1988_v9 = vadd.f32 -1.4531521, %v1980_v63  ;;  %v1981_v23 = vmul.f32 1.0614054, %v3680_v11  ;;  %v3684_v57 = vpop.eup %3128  ;;  %3148 = vpow2.f32 %v2080_v12 }
 0xa59   : > { %v1990_v13 = vadd.f32 -1.4531521, %v1982_v1  ;;  %v1983_v32 = vmul.f32 1.0614054, %v3684_v57  ;;  %3150 = vpow2.f32 %v2078_v10 }
 0xa5a   : > { %v1996_v56 = vmul.f32 %v3673_v55, %v1988_v9  ;;  %v1989_v31 = vadd.f32 -1.4531521, %v1981_v23  ;;  %v3690_v44 = vpop.eup %3130 }
 0xa5b   : > { %v1998_v24 = vmul.f32 %v3676_v62, %v1990_v13  ;;  %v1991_v41 = vadd.f32 -1.4531521, %v1983_v32  ;;  %v1984_v51 = vmul.f32 1.0614054, %v3690_v44  ;;  %v3696_v54 = vpop.eup %3132 }
 0xa5c   : > { %v2004_v28 = vadd.f32 1.4214138, %v1996_v56  ;;  %v1997_v3 = vmul.f32 %v3680_v11, %v1989_v31  ;;  %v3700_v1 = vpop.eup %3134  ;;  %v1986_v5 = vmul.f32 1.0614054, %v3696_v54 }
 0xa5d   : > { %v2006_v4 = vadd.f32 1.4214138, %v1998_v24  ;;  %v1999_v50 = vmul.f32 %v3684_v57, %v1991_v41  ;;  %v1992_v0 = vadd.f32 -1.4531521, %v1984_v51  ;;  %v1985_v16 = vmul.f32 1.0614054, %v3700_v1 }
 0xa5e   : > { %v2012_v36 = vmul.f32 %v3673_v55, %v2004_v28  ;;  %v2005_v49 = vadd.f32 1.4214138, %v1997_v3  ;;  %v1994_v13 = vadd.f32 -1.4531521, %v1986_v5  ;;  %v2082_v3 = vmul.f32 1.442695, %v2067_v6 }
 0xa5f   : > { %v2014_v21 = vmul.f32 %v3676_v62, %v2006_v4  ;;  %v2007_v63 = vadd.f32 1.4214138, %v1999_v50  ;;  %v2000_v9 = vmul.f32 %v3690_v44, %v1992_v0  ;;  %v3707_v56 = vpop.eup %3136  ;;  %v1993_v28 = vadd.f32 -1.4531521, %v1985_v16 }
 0xa60   : > { %v2020_v48 = vadd.f32 -0.28449672, %v2012_v36  ;;  %v2013_v61 = vmul.f32 %v3680_v11, %v2005_v49  ;;  %v2002_v27 = vmul.f32 %v3696_v54, %v1994_v13  ;;  %v1987_v31 = vmul.f32 1.0614054, %v3707_v56  ;;  %v3139_v41 = vpop.eup %3138 }
 0xa61   : > { %v2022_v45 = vadd.f32 -0.28449672, %v2014_v21  ;;  %v2015_v8 = vmul.f32 %v3684_v57, %v2007_v63  ;;  %v2008_v25 = vadd.f32 1.4214138, %v2000_v9  ;;  %v2001_v35 = vmul.f32 %v3700_v1, %v1993_v28  ;;  %v3141_v49 = vpop.eup %3140 }
 0xa62   : > { %v2028_v59 = vmul.f32 %v3673_v55, %v2020_v48  ;;  %v2021_v7 = vadd.f32 -0.28449672, %v2013_v61  ;;  %v2010_v52 = vadd.f32 1.4214138, %v2002_v27  ;;  %v1995_v36 = vadd.f32 -1.4531521, %v1987_v31 }
 0xa63   : > { %v2023_v24 = vadd.f32 -0.28449672, %v2015_v8  ;;  %v2030_v26 = vmul.f32 %v3676_v62, %v2022_v45  ;;  %v2016_v34 = vmul.f32 %v3690_v44, %v2008_v25  ;;  %v2009_v12 = vadd.f32 1.4214138, %v2001_v35 }
 0xa64   : > { %v2036_v22 = vadd.f32 0.2548296, %v2028_v59  ;;  %v2029_v23 = vmul.f32 %v3680_v11, %v2021_v7  ;;  %v2018_v51 = vmul.f32 %v3696_v54, %v2010_v52  ;;  %v2003_v53 = vmul.f32 %v3707_v56, %v1995_v36  ;;  %v3143_v59 = vpop.eup %3142 }
 0xa65   : > { %v2031_v4 = vmul.f32 %v3684_v57, %v2023_v24  ;;  %v2024_v48 = vadd.f32 -0.28449672, %v2016_v34  ;;  %v2038_v50 = vadd.f32 0.2548296, %v2030_v26  ;;  %v2017_v45 = vmul.f32 %v3700_v1, %v2009_v12 }
 0xa66   : > { %v2037_v32 = vadd.f32 0.2548296, %v2029_v23  ;;  %v2044_v21 = vmul.f32 %v3673_v55, %v2036_v22  ;;  %v2026_v0 = vadd.f32 -0.28449672, %v2018_v51  ;;  %v2011_v5 = vadd.f32 1.4214138, %v2003_v53  ;;  %v3145_v55 = vpop.eup %3144 }
 0xa67   : > { %v2039_v46 = vadd.f32 0.2548296, %v2031_v4  ;;  %v2032_v61 = vmul.f32 %v3690_v44, %v2024_v48  ;;  %3152 = vpow2.f32 %v2082_v3  ;;  %v2046_v9 = vmul.f32 %v3676_v62, %v2038_v50  ;;  %v3147_v16 = vpop.eup %3146 }
 0xa68   : > { %v2045_v39 = vmul.f32 %v3680_v11, %v2037_v32  ;;  %v2084_v7 = vmul.f32 %v3139_v41, %v2044_v21  ;;  %v2034_v10 = vmul.f32 %v3696_v54, %v2026_v0  ;;  %v2025_v13 = vadd.f32 -0.28449672, %v2017_v45  ;;  %v3149_v26 = vpop.eup %3148 }
 0xa69   : > { %v2047_v11 = vmul.f32 %v3684_v57, %v2039_v46  ;;  %v2040_v8 = vadd.f32 0.2548296, %v2032_v61  ;;  %v2019_v25 = vmul.f32 %v3707_v56, %v2011_v5  ;;  %v2086_v31 = vmul.f32 %v3141_v49, %v2046_v9  ;;  %v3151_v52 = vpop.eup %3150 }
 0xa6a   : > { %v2085_v63 = vmul.f32 %v3143_v59, %v2045_v39  ;;  %v2042_v23 = vadd.f32 0.2548296, %v2034_v10  ;;  %v2033_v24 = vmul.f32 %v3700_v1, %v2025_v13  ;;  %v2092_v27 = vsub.f32 1.0, %v2084_v7 }
 0xa6b   : > { %v2048_v6 = vmul.f32 %v3690_v44, %v2040_v8  ;;  %v2087_v28 = vmul.f32 %v3145_v55, %v2047_v11  ;;  %v2027_v4 = vadd.f32 -0.28449672, %v2019_v25  ;;  %v2094_v46 = vsub.f32 1.0, %v2086_v31 }
 0xa6c   : > { %v2093_v22 = vsub.f32 1.0, %v2085_v63  ;;  %v2050_v32 = vmul.f32 %v3696_v54, %v2042_v23  ;;  %v2041_v62 = vadd.f32 0.2548296, %v2033_v24  ;;  %v2108_v3 = vsub.f32 0.0, %v2092_v27 }
 0xa6d   : > { %v2088_v57 = vmul.f32 %v3147_v16, %v2048_v6  ;;  %v2095_v41 = vsub.f32 1.0, %v2087_v28  ;;  %v2035_v39 = vmul.f32 %v3707_v56, %v2027_v4  ;;  %v1925_v59 = vmul.f32 0.5, %v3633_v18 }
 0xa6e   : > { %v2109_v35 = vsub.f32 0.0, %v2093_v22  ;;  %v2090_v36 = vmul.f32 %v3149_v26, %v2050_v32  ;;  %v2049_v44 = vmul.f32 %v3700_v1, %v2041_v62  ;;  %v2116_v53 = vsel %vm2100_vm6, %v2092_v27, %v2108_v3 }
 0xa6f   : > { %v2096_v34 = vsub.f32 1.0, %v2088_v57  ;;  %v2043_v50 = vadd.f32 0.2548296, %v2035_v39  ;;  %v2111_v61 = vsub.f32 0.0, %v2095_v41  ;;  %v2110_v0 = vsub.f32 0.0, %v2094_v46 }
 0xa70   : > { %v2098_v48 = vsub.f32 1.0, %v2090_v36  ;;  %v2089_v49 = vmul.f32 %v3151_v52, %v2049_v44  ;;  %v2117_v51 = vsel %vm2101_vm7, %v2093_v22, %v2109_v35  ;;  %v2124_v55 = vadd.f32 1.0, %v2116_v53  ;;  %v2786_v39 = vld [vmem:[%s685_s24] ss:$0 sm:$0xff] }
 0xa71   : > { %v2112_v21 = vsub.f32 0.0, %v2096_v34  ;;  %v2051_v63 = vmul.f32 %v3707_v56, %v2043_v50  ;;  %v2125_v19 = vadd.f32 1.0, %v2117_v51  ;;  %v1928_v7 = vmul.f32 0.5, %v3647_v30 }
 0xa72   : > { %v2114_v1 = vsub.f32 0.0, %v2098_v48  ;;  %v2097_v12 = vsub.f32 1.0, %v2089_v49  ;;  %v2119_v8 = vsel %vm2103_vm9, %v2095_v41, %v2111_v61  ;;  %v1929_v56 = vmul.f32 0.5, %v3654_v38 }
 0xa73   : > { %v2120_v54 = vsel %vm2104_vm5, %v2096_v34, %v2112_v21  ;;  %v2118_v13 = vsel %vm2102_vm8, %v2094_v46, %v2110_v0  ;;  %v2133_v40 = vmul.f32 %v2125_v19, %v1925_v59  ;;  %v2132_v23 = vmul.f32 %v2124_v55, %v1924_v20 }
 0xa74   : > { %v3153_v37 = vpop.eup %3152  ;;  %v2128_v17 = vadd.f32 1.0, %v2120_v54  ;;  %v2113_v45 = vsub.f32 0.0, %v2097_v12  ;;  %v2122_v11 = vsel %vm2106_vm10, %v2098_v48, %v2114_v1  ;;  %v2127_v24 = vadd.f32 1.0, %v2119_v8 }
 0xa75   : > { %v2091_v5 = vmul.f32 %v3153_v37, %v2051_v63  ;;  %v2130_v6 = vadd.f32 1.0, %v2122_v11  ;;  %v2126_v30 = vadd.f32 1.0, %v2118_v13  ;;  %v1930_v25 = vmul.f32 0.5, %v3652_v2 }
 0xa76   : > { %v2121_v18 = vsel %vm2105_vm11, %v2097_v12, %v2113_v45  ;;  %v2136_v16 = vmul.f32 %v2128_v17, %v1928_v7  ;;  %v1927_v27 = vmul.f32 0.5, %v3635_v60  ;;  %v1926_v57 = vmul.f32 0.5, %v3625_v15 }
 0xa77   : > { %v2129_v9 = vadd.f32 1.0, %v2121_v18  ;;  %v2099_v10 = vsub.f32 1.0, %v2091_v5  ;;  %v2138_v31 = vmul.f32 %v2130_v6, %v1930_v25 }
 0xa78   : > { %v2140_v14 = vpack.c.bf16 %v2136_v16, %v2132_v23  ;;  %v2135_v32 = vmul.f32 %v2127_v24, %v1927_v27  ;;  %v2134_v47 = vmul.f32 %v2126_v30, %v1926_v57 }
 0xa79   : > { %v2137_v42 = vmul.f32 %v2129_v9, %v1929_v56  ;;  %v2115_v22 = vsub.f32 0.0, %v2099_v10 }
 0xa7a   : > { %v2142_v2 = vpack.c.bf16 %v2138_v31, %v2134_v47 }
 0xa7b   : > { %v2123_v38 = vsel %vm2107_vm12, %v2099_v10, %v2115_v22  ;;  %v2141_v26 = vpack.c.bf16 %v2137_v42, %v2133_v40 }
 0xa7c   : > { %v2131_v28 = vadd.f32 1.0, %v2123_v38 }
 0xa7d   : > { %2439 = vmatprep.mubr.bf16.mxu1 %v2141_v26 }
 0xa7e   : > { %v2139_v62 = vmul.f32 %v2131_v28, %v1931_v58  ;;  %2440 = vmatmul.mubr.bf16.vlgmr.msra.gmra.mxu1 %v2140_v14 }
 0xa80   : > { %v2143_v4 = vpack.c.bf16 %v2139_v62, %v2135_v32 }
 0xa82   : > { %2480 = vmatprep.mubr.bf16.mxu0 %v2143_v4 }
 0xa83   : > { %2481 = vmatmul.mubr.bf16.vlgmr.msra.gmra.mxu0 %v2142_v2 }
 0xb3e   : > { %v2842_v34 = vpop.f32.mrf.mxu1 }
 0xb40   : > { %v2843_v60 = vpop.f32.mrf.mxu1 }
 0xb41   : > { %v2844_v52 = vadd.f32 %v2843_v60, %v2842_v34 }
 0xb42   : > { %v2845_v15 = vpop.f32.mrf.mxu1 }
 0xb43   : > { %v2864_v35 = vpop.f32.mrf.mxu0  ;;  %v2442_v36 = vadd.f32 %v2844_v52, %v2753_v43 }
 0xb44   : > { %v2846_v44 = vpop.f32.mrf.mxu1 }
 0xb45   : > { %v2865_v3 = vpop.f32.mrf.mxu0  ;;  %v2847_v41 = vadd.f32 %v2846_v44, %v2845_v15 }
 0xb46   : > { %v2866_v21 = vadd.f32 %v2865_v3, %v2864_v35 }
 0xb47   : > { %v2867_v46 = vpop.f32.mrf.mxu0  ;;  %v2445_v49 = vadd.f32 %v2847_v41, %v2753_v43 }
 0xb48   : > { %v2483_v48 = vadd.f32 %v2866_v21, %v2442_v36 }
 0xb49   : > { %v2868_v54 = vpop.f32.mrf.mxu0 }
 0xb4a   : > { %v2496_v50 = vmul.f32 %v2786_v39, %v2483_v48  ;;  %v2869_v51 = vadd.f32 %v2868_v54, %v2867_v46 }
 0xb4c   : > { %v2498_v1 = vadd.f32 %v2496_v50, %v3522_v29  ;;  %v2486_v12 = vadd.f32 %v2869_v51, %v2445_v49 }
 0xb4e   : > { %2500 = vst [vmem:[%s3806_s22] sm:$0xff] %v2498_v1  ;;  %v2497_v53 = vmul.f32 %v2786_v39, %v2486_v12 }
 0xb50   : > { %v2499_v59 = vadd.f32 %v2497_v53, %v3526_v33 }
 0xb52   : > { %2501 = vst [vmem:[%s3806_s22 + $0x8] sm:$0xff] %v2499_v59 }
 0xb53 PF: > { %s3815_s20 = sld [smem:[#allocation2_spill]] }
 0xb59   : > { %s25_s18 = sadd.s32 1, %s3815_s20  }
 0xb5a   : > { %p22_p5 = scmp.ge.s32.totalorder %s25_s18, 4  }
 0xb5c   :  { %24 = sbr.rel (!%p22_p5) target bundleno = 8 (0x8), region = 149 }

</bundles_post_ra>
